<compile_context>
chip_gen: v5e
topology: v5e:2x2
jax: 0.10.0
libtpu: 0.0.40
codegen_flags: <defaults>
</compile_context>

<pallas_src>
import numpy as np
import jax
import jax.numpy as jnp
from jax import lax
from jax.experimental import pallas as pl
from jax.experimental.pallas import tpu as pltpu


# ---------------------------------------------------------------------------
# Fused kernel: 3x3 conv (zero pad) + bias + ReLU + 2x bilinear upsample (H,W)
# One (batch, row-tile) block per grid step.
# ---------------------------------------------------------------------------
def _conv_relu_upsample_kernel(x_ref, t_ref, b_ref, w_ref, bias_ref, o_ref,
                               xpad_ref, yc_ref):
    # x_ref   : (1, TH, W, Cin)        tile rows
    # t_ref   : (1, 2, W, Cin)         halo rows above  (i*TH-2, i*TH-1)
    # b_ref   : (1, 2, W, Cin)         halo rows below  (i*TH+TH, i*TH+TH+1)
    # w_ref   : (9*Cin, Cout)          weights, K order = (ky, kx, cin)
    # bias_ref: (1, Cout)              f32 bias
    # o_ref   : (1, TH, 2, W, 2*Cout)  [row-phase | col-phase-major lanes]
    # xpad_ref: (TH+4, W+2, Cin)       VMEM scratch: zero-padded input window
    # yc_ref  : (TH+2, W+2, Cout) f32  VMEM scratch: conv out + replicated borders
    TH, W, Cin = x_ref.shape[1], x_ref.shape[2], x_ref.shape[3]
    Cout = bias_ref.shape[1]
    HC = TH + 2                      # conv rows produced: tile rows + 1 halo row each side

    i = pl.program_id(1)
    n_t = pl.num_programs(1)
    dt = x_ref.dtype

    # ---- assemble the zero-padded input window in VMEM (no value concats) ----
    # zero border columns every step (cheap; safe under per-core grid sharding)
    xpad_ref[:, 0:1, :] = jnp.zeros((TH + 4, 1, Cin), dt)
    xpad_ref[:, W + 1:W + 2, :] = jnp.zeros((TH + 4, 1, Cin), dt)
    # tile rows
    xpad_ref[2:TH + 2, 1:W + 1, :] = x_ref[0]
    # halo rows; at the true image boundary the conv pad is zero -> select (Inf-safe)
    top = t_ref[0]
    bot = b_ref[0]
    xpad_ref[0:2, 1:W + 1, :] = jnp.where(i > 0, top, jnp.zeros_like(top))
    xpad_ref[TH + 2:TH + 4, 1:W + 1, :] = jnp.where(i < n_t - 1, bot,
                                                    jnp.zeros_like(bot))

    # ---- 3x3 conv = 9 accumulating MXU matmuls (K = Cin each), f32 accumulate ----
    acc = jnp.zeros((HC * W, Cout), jnp.float32)
    for dy in range(3):
        for dx in range(3):
            patch = xpad_ref[dy:dy + HC, dx:dx + W, :].reshape(HC * W, Cin)
            k0 = (dy * 3 + dx) * Cin
            acc = acc + jnp.dot(patch, w_ref[k0:k0 + Cin, :],
                                preferred_element_type=jnp.float32)
    yc = jnp.maximum(acc + bias_ref[...], 0.0).reshape(HC, W, Cout)
    # yc[k] = conv+bias+ReLU at global row i*TH + (k-1), k = 0..TH+1

    # ---- stage conv output with replicated (clamped) borders into yc_ref ----
    yc_ref[:, 1:W + 1, :] = yc
    yc_ref[:, 0:1, :] = yc[:, 0:1, :]                  # clamp left  (col -1 -> col 0)
    yc_ref[:, W + 1:W + 2, :] = yc[:, W - 1:W, :]      # clamp right (col W  -> col W-1)

    @pl.when(i == 0)                                   # clamp above the image
    def _():
        yc_ref[0:1, :, :] = yc_ref[1:2, :, :]

    @pl.when(i == n_t - 1)                             # clamp below the image
    def _():
        yc_ref[TH + 1:TH + 2, :, :] = yc_ref[TH:TH + 1, :, :]

    # ---- 2x bilinear upsample, half-pixel centers (PyTorch trilinear, (2,2,1)) ----
    #   out[2k]   = 0.75*y[k] + 0.25*y[k-1]   out[2k+1] = 0.75*y[k] + 0.25*y[k+1]
    # Row / column neighbours are plain shifted ref slices of the padded scratch.
    yc_c = yc_ref[1:TH + 1, :, :]                          # (TH, W+2, Cout)
    rc_e = 0.75 * yc_c + 0.25 * yc_ref[0:TH, :, :]         # even output rows 2g
    rc_o = 0.75 * yc_c + 0.25 * yc_ref[2:TH + 2, :, :]     # odd  output rows 2g+1

    odt = o_ref.dtype
    # even rows
    o_ref[0, :, 0, :, 0:Cout] = (0.75 * rc_e[:, 1:W + 1] +
                                 0.25 * rc_e[:, 0:W]).astype(odt)        # even cols
    o_ref[0, :, 0, :, Cout:2 * Cout] = (0.75 * rc_e[:, 1:W + 1] +
                                        0.25 * rc_e[:, 2:W + 2]).astype(odt)  # odd cols
    # odd rows
    o_ref[0, :, 1, :, 0:Cout] = (0.75 * rc_o[:, 1:W + 1] +
                                 0.25 * rc_o[:, 0:W]).astype(odt)
    o_ref[0, :, 1, :, Cout:2 * Cout] = (0.75 * rc_o[:, 1:W + 1] +
                                        0.25 * rc_o[:, 2:W + 2]).astype(odt)


# ---------------------------------------------------------------------------
# VMEM budgeting / tile selection
# ---------------------------------------------------------------------------
def _vmem_budgets():
    """(scoped vmem limit, per-step working-set budget), per TPU generation."""
    try:
        cap = int(pltpu.get_tpu_info().vmem_capacity_bytes)
    except Exception:
        cap = 64 * 1024 * 1024                       # conservative (v7x-sized)
    vmem_limit = min(cap * 3 // 4, 96 * 1024 * 1024)  # ~48 MiB v7x, 96 MiB v5e/v6e
    tile_budget = vmem_limit // 4                     # headroom for pipeline + spills
    return vmem_limit, tile_budget


def _pick_row_tile(h, w, c_in, c_out, x_isz, w_isz, budget_bytes):
    """Largest row tile whose full working set (inputs x2, output x2, resident
    weights x1, both scratches, f32 temporaries) fits the budget."""
    cands = sorted({d for d in range(4, h + 1, 4) if h % d == 0} | {h}, reverse=True)

    def bytes_per_step(th):
        x_blk = th * w * c_in * x_isz
        halo = 4 * w * c_in * x_isz
        out_blk = 4 * th * w * c_out * x_isz
        weights = (9 * c_in * c_out + c_out) * w_isz          # single-buffered
        xpad = (th + 4) * (w + 2) * c_in * x_isz              # scratch
        ycpad = (th + 2) * (w + 2) * c_out * 4                # f32 scratch
        temps = ((th + 2) * w * c_out * 4 +                   # matmul accumulator
                 2 * th * (w + 2) * c_out * 4 +               # rc_e / rc_o planes
                 th * w * c_out * 4)                          # store plane
        return 2 * (x_blk + halo + out_blk) + weights + xpad + ycpad + temps

    for th in cands:
        if bytes_per_step(th) <= budget_bytes:
            return th
    return cands[-1]


def _const_spec(shape, index_map):
    """BlockSpec for grid-invariant operands; single-buffered when supported."""
    buffered = getattr(pl, "Buffered", None)
    if buffered is not None:
        try:
            return pl.BlockSpec(shape, index_map, pipeline_mode=buffered(1))
        except TypeError:
            pass
    return pl.BlockSpec(shape, index_map)


# ---------------------------------------------------------------------------
# UpsampleBlock3D forward  (norm_layer=Identity, apply_blur=False, upsample=True)
# ---------------------------------------------------------------------------
def upsample_block_3d(x_bchwt, w_oihw1, bias, row_tile=None):
    b, c_in, h, w, t = x_bchwt.shape
    c_out = w_oihw1.shape[0]
    assert h >= 2 and w >= 2
    B = b * t

    # TODO(synk): these two HBM transposes vanish if the surrounding model is
    # kept channels-last (b,t,h,w,c); kept here to honour the PyTorch layout.
    x_nhwc = jnp.transpose(x_bchwt, (0, 4, 2, 3, 1)).reshape(B, h, w, c_in)
    # (out, in, 3, 3, 1) -> (ky, kx, in, out) -> (9*in, out), matching kernel K order.
    w_flat = jnp.transpose(w_oihw1[:, :, :, :, 0],
                           (2, 3, 1, 0)).reshape(9 * c_in, c_out).astype(x_nhwc.dtype)
    b2 = bias.reshape(1, c_out).astype(jnp.float32)

    vmem_limit, tile_budget = _vmem_budgets()
    if row_tile is not None:
        th = row_tile
    else:
        th = _pick_row_tile(h, w, c_in, c_out,
                            jnp.dtype(x_nhwc.dtype).itemsize,
                            jnp.dtype(w_flat.dtype).itemsize, tile_budget)
        if B == 1 and th == h:                       # keep >=2 grid steps for megacore
            smaller = [d for d in range(4, h, 4) if h % d == 0]
            if smaller:
                th = max(smaller)
    assert h % th == 0 and (th == h or th % 4 == 0) and th >= 2
    n_t = h // th
    th2 = th // 2
    last_hblk = max(h // 2 - 1, 0)                   # last full 2-row halo block

    out6 = pl.pallas_call(
        _conv_relu_upsample_kernel,
        out_shape=jax.ShapeDtypeStruct((B, h, 2, w, 2 * c_out), x_nhwc.dtype),
        grid_spec=pltpu.PrefetchScalarGridSpec(
            num_scalar_prefetch=0,
            grid=(B, n_t),
            in_specs=[
                pl.BlockSpec((1, th, w, c_in), lambda bi, i: (bi, i, 0, 0)),
                # top halo pair = rows (i*th-2, i*th-1); clamped (unused -> zeroed in-kernel)
                pl.BlockSpec((1, 2, w, c_in),
                             lambda bi, i: (bi, jnp.maximum(i * th2 - 1, 0), 0, 0)),
                # bottom halo pair = rows ((i+1)*th, (i+1)*th+1); clamped likewise
                pl.BlockSpec((1, 2, w, c_in),
                             lambda bi, i: (bi, jnp.minimum((i + 1) * th2, last_hblk),
                                            0, 0)),
                _const_spec((9 * c_in, c_out), lambda bi, i: (0, 0)),
                _const_spec((1, c_out), lambda bi, i: (0, 0)),
            ],
            out_specs=pl.BlockSpec((1, th, 2, w, 2 * c_out),
                                   lambda bi, i: (bi, i, 0, 0, 0)),
            scratch_shapes=[
                pltpu.VMEM((th + 4, w + 2, c_in), x_nhwc.dtype),
                pltpu.VMEM((th + 2, w + 2, c_out), jnp.float32),
            ]),
        compiler_params=pltpu.CompilerParams(
            dimension_semantics=("parallel", "parallel"),
            vmem_limit_bytes=vmem_limit),
    )(x_nhwc, x_nhwc, x_nhwc, w_flat, b2)

    # (B, h, 2, w, 2*c_out) == (b, t, 2h, 2w, c_out) contiguously: pure reshape.
    y = out6.reshape(b, t, 2 * h, 2 * w, c_out)
    return jnp.transpose(y, (0, 4, 2, 3, 1))         # back to (b, c_out, 2h, 2w, t)


# ---------------------------------------------------------------------------
# Pure-JAX / numpy reference (PyTorch semantics) for validation
# ---------------------------------------------------------------------------
def _ref_upsample_axis(a, axis):
    n = a.shape[axis]
    dst = np.arange(2 * n)
    src = np.maximum((dst + 0.5) / 2.0 - 0.5, 0.0)
    i0 = np.floor(src).astype(np.int64)
    i1 = np.minimum(i0 + 1, n - 1)
    w1 = (src - i0).astype(a.dtype)
    a0 = np.take(a, i0, axis=axis)
    a1 = np.take(a, i1, axis=axis)
    shp = [1] * a.ndim
    shp[axis] = 2 * n
    w1 = w1.reshape(shp)
    return a0 * (1.0 - w1) + a1 * w1


def reference(x_bchwt, w_oihw1, bias):
    b, c_in, h, w, t = x_bchwt.shape
    c_out = w_oihw1.shape[0]
    x_nhwc = jnp.transpose(x_bchwt, (0, 4, 2, 3, 1)).reshape(b * t, h, w, c_in)
    w_hwio = jnp.transpose(w_oihw1[:, :, :, :, 0], (2, 3, 1, 0))
    y = lax.conv_general_dilated(x_nhwc, w_hwio, (1, 1), ((1, 1), (1, 1)),
                                 dimension_numbers=("NHWC", "HWIO", "NHWC"))
    y = jnp.maximum(y + bias, 0.0)
    y = np.asarray(y)
    y = _ref_upsample_axis(y, 1)
    y = _ref_upsample_axis(y, 2)
    y = y.reshape(b, t, 2 * h, 2 * w, c_out)
    return np.transpose(y, (0, 4, 2, 3, 1))


if __name__ == "__main__":
    key = jax.random.PRNGKey(0)
    fwd = jax.jit(upsample_block_3d, static_argnames="row_tile")

    def run_case(b, in_ch, out_ch, h, w, t, row_tile, k):
        k1, k2, k3 = jax.random.split(k, 3)
        x = jax.random.normal(k1, (b, in_ch, h, w, t), dtype=jnp.float32)
        cw = jax.random.normal(k2, (out_ch, in_ch, 3, 3, 1), dtype=jnp.float32) * 0.1
        cb = jax.random.normal(k3, (out_ch,), dtype=jnp.float32) * 0.1
        out = jax.block_until_ready(fwd(x, cw, cb, row_tile=row_tile))
        ref = reference(x, cw, cb)
        assert out.shape == (b, out_ch, 2 * h, 2 * w, t), out.shape
        np.testing.assert_allclose(np.asarray(out), ref, rtol=1e-4, atol=1e-4)

    # Single row tile per image (first + last tile handling coincide).
    run_case(2, 8, 16, 8, 8, 4, None, jax.random.fold_in(key, 0))
    # Row-tiled case: exercises merged 2-row halo fetch + first/interior/last tiles.
    run_case(1, 8, 16, 16, 8, 2, 4, jax.random.fold_in(key, 1))
    print("KERNEL_OK")
</pallas_src>

<mosaic_0001>
module attributes {stable_mosaic.version = 11 : i64} {
  func.func @_conv_relu_upsample_kernel(%arg0: i32, %arg1: i32, %arg2: memref<1x8x8x8xf32, #tpu.memory_space<vmem>>, %arg3: memref<1x2x8x8xf32, #tpu.memory_space<vmem>>, %arg4: memref<1x2x8x8xf32, #tpu.memory_space<vmem>>, %arg5: memref<72x16xf32, #tpu.memory_space<vmem>>, %arg6: memref<1x16xf32, #tpu.memory_space<vmem>>, %arg7: memref<1x8x2x8x32xf32, #tpu.memory_space<vmem>>, %arg8: memref<12x10x8xf32, #tpu.memory_space<vmem>>, %arg9: memref<10x10x16xf32, #tpu.memory_space<vmem>>) attributes {dimension_semantics = [#tpu.dimension_semantics<parallel>, #tpu.dimension_semantics<parallel>], iteration_bounds = array<i64: 8, 1>, scalar_prefetch = 0 : i64, scratch_operands = 2 : i64, tpu.core_type = #tpu.core_type<tc>, window_params = [{transform_indices = @transform_0, window_bounds = array<i64: 1, 8, 8, 8>}, {transform_indices = @transform_1, window_bounds = array<i64: 1, 2, 8, 8>}, {transform_indices = @transform_2, window_bounds = array<i64: 1, 2, 8, 8>}, {pipeline_mode = #tpu.pipeline_mode<synchronous>, transform_indices = @transform_3, window_bounds = array<i64: 72, 16>}, {pipeline_mode = #tpu.pipeline_mode<synchronous>, transform_indices = @transform_4, window_bounds = array<i64: 1, 16>}, {transform_indices = @transform_5, window_bounds = array<i64: 1, 8, 2, 8, 32>}]} {
    %cst = arith.constant 0.000000e+00 : f32
    %0 = vector.broadcast %cst : f32 to vector<12x1x8xf32>
    %c0 = arith.constant 0 : index
    %c0_0 = arith.constant 0 : index
    %c0_1 = arith.constant 0 : index
    %1 = vector.load %arg8[%c0, %c0_0, %c0_1] : memref<12x10x8xf32, #tpu.memory_space<vmem>>, vector<12x1x8xf32>
    tpu.vector_store %arg8[%c0, %c0_0, %c0_1], %0 {strides = array<i32>} : memref<12x10x8xf32, #tpu.memory_space<vmem>>, vector<12x1x8xf32>,
    %cst_2 = arith.constant 0.000000e+00 : f32
    %2 = vector.broadcast %cst_2 : f32 to vector<12x1x8xf32>
    %c0_3 = arith.constant 0 : index
    %c9 = arith.constant 9 : index
    %c0_4 = arith.constant 0 : index
    %3 = vector.load %arg8[%c0_3, %c9, %c0_4] : memref<12x10x8xf32, #tpu.memory_space<vmem>>, vector<12x1x8xf32>
    tpu.vector_store %arg8[%c0_3, %c9, %c0_4], %2 {strides = array<i32>} : memref<12x10x8xf32, #tpu.memory_space<vmem>>, vector<12x1x8xf32>,
    %c0_5 = arith.constant 0 : index
    %c0_6 = arith.constant 0 : index
    %c0_7 = arith.constant 0 : index
    %c0_8 = arith.constant 0 : index
    %4 = vector.load %arg2[%c0_5, %c0_6, %c0_7, %c0_8] : memref<1x8x8x8xf32, #tpu.memory_space<vmem>>, vector<1x8x8x8xf32>
    %5 = vector.shape_cast %4 : vector<1x8x8x8xf32> to vector<8x8x8xf32>
    %c2 = arith.constant 2 : index
    %c1 = arith.constant 1 : index
    %c0_9 = arith.constant 0 : index
    %6 = vector.load %arg8[%c2, %c1, %c0_9] : memref<12x10x8xf32, #tpu.memory_space<vmem>>, vector<8x8x8xf32>
    tpu.vector_store %arg8[%c2, %c1, %c0_9], %5 {strides = array<i32>} : memref<12x10x8xf32, #tpu.memory_space<vmem>>, vector<8x8x8xf32>,
    %c0_10 = arith.constant 0 : index
    %c0_11 = arith.constant 0 : index
    %c0_12 = arith.constant 0 : index
    %c0_13 = arith.constant 0 : index
    %7 = vector.load %arg3[%c0_10, %c0_11, %c0_12, %c0_13] : memref<1x2x8x8xf32, #tpu.memory_space<vmem>>, vector<1x2x8x8xf32>
    %8 = vector.shape_cast %7 : vector<1x2x8x8xf32> to vector<2x8x8xf32>
    %c0_14 = arith.constant 0 : index
    %c0_15 = arith.constant 0 : index
    %c0_16 = arith.constant 0 : index
    %c0_17 = arith.constant 0 : index
    %9 = vector.load %arg4[%c0_14, %c0_15, %c0_16, %c0_17] : memref<1x2x8x8xf32, #tpu.memory_space<vmem>>, vector<1x2x8x8xf32>
    %10 = vector.shape_cast %9 : vector<1x2x8x8xf32> to vector<2x8x8xf32>
    %c0_i32 = arith.constant 0 : i32
    %11 = arith.cmpi sgt, %arg1, %c0_i32 : i32
    %cst_18 = arith.constant 0.000000e+00 : f32
    %12 = vector.broadcast %cst_18 : f32 to vector<2x8x8xf32>
    %13 = arith.select %11, %8, %12 : vector<2x8x8xf32>
    %c0_19 = arith.constant 0 : index
    %c1_20 = arith.constant 1 : index
    %c0_21 = arith.constant 0 : index
    %14 = vector.load %arg8[%c0_19, %c1_20, %c0_21] : memref<12x10x8xf32, #tpu.memory_space<vmem>>, vector<2x8x8xf32>
    tpu.vector_store %arg8[%c0_19, %c1_20, %c0_21], %13 {strides = array<i32>} : memref<12x10x8xf32, #tpu.memory_space<vmem>>, vector<2x8x8xf32>,
    %c0_i32_22 = arith.constant 0 : i32
    %15 = arith.cmpi slt, %arg1, %c0_i32_22 : i32
    %cst_23 = arith.constant 0.000000e+00 : f32
    %16 = vector.broadcast %cst_23 : f32 to vector<2x8x8xf32>
    %17 = arith.select %15, %10, %16 : vector<2x8x8xf32>
    %c10 = arith.constant 10 : index
    %c1_24 = arith.constant 1 : index
    %c0_25 = arith.constant 0 : index
    %18 = vector.load %arg8[%c10, %c1_24, %c0_25] : memref<12x10x8xf32, #tpu.memory_space<vmem>>, vector<2x8x8xf32>
    tpu.vector_store %arg8[%c10, %c1_24, %c0_25], %17 {strides = array<i32>} : memref<12x10x8xf32, #tpu.memory_space<vmem>>, vector<2x8x8xf32>,
    %cst_26 = arith.constant 0.000000e+00 : f32
    %19 = vector.broadcast %cst_26 : f32 to vector<80x16xf32>
    %c0_27 = arith.constant 0 : index
    %c0_28 = arith.constant 0 : index
    %c0_29 = arith.constant 0 : index
    %20 = vector.load %arg8[%c0_27, %c0_28, %c0_29] : memref<12x10x8xf32, #tpu.memory_space<vmem>>, vector<10x8x8xf32>
    %21 = vector.shape_cast %20 : vector<10x8x8xf32> to vector<80x8xf32>
    %c0_30 = arith.constant 0 : index
    %c0_31 = arith.constant 0 : index
    %22 = vector.load %arg5[%c0_30, %c0_31] : memref<72x16xf32, #tpu.memory_space<vmem>>, vector<8x16xf32>
    %cst_32 = arith.constant dense<0.000000e+00> : vector<80x16xf32>
    %23 = tpu.matmul %21, %22, %cst_32 {dimension_numbers = #tpu.dot_dimension_numbers<[1], [0], [0], [1], [0, 0, 1, 1], [], []>} : vector<80x8xf32>, vector<8x16xf32>, vector<80x16xf32> -> vector<80x16xf32>
    %24 = arith.addf %19, %23 : vector<80x16xf32>
    %c0_33 = arith.constant 0 : index
    %c1_34 = arith.constant 1 : index
    %c0_35 = arith.constant 0 : index
    %25 = vector.load %arg8[%c0_33, %c1_34, %c0_35] : memref<12x10x8xf32, #tpu.memory_space<vmem>>, vector<10x8x8xf32>
    %26 = vector.shape_cast %25 : vector<10x8x8xf32> to vector<80x8xf32>
    %c8 = arith.constant 8 : index
    %c0_36 = arith.constant 0 : index
    %27 = vector.load %arg5[%c8, %c0_36] : memref<72x16xf32, #tpu.memory_space<vmem>>, vector<8x16xf32>
    %cst_37 = arith.constant dense<0.000000e+00> : vector<80x16xf32>
    %28 = tpu.matmul %26, %27, %cst_37 {dimension_numbers = #tpu.dot_dimension_numbers<[1], [0], [0], [1], [0, 0, 1, 1], [], []>} : vector<80x8xf32>, vector<8x16xf32>, vector<80x16xf32> -> vector<80x16xf32>
    %29 = arith.addf %24, %28 : vector<80x16xf32>
    %c0_38 = arith.constant 0 : index
    %c2_39 = arith.constant 2 : index
    %c0_40 = arith.constant 0 : index
    %30 = vector.load %arg8[%c0_38, %c2_39, %c0_40] : memref<12x10x8xf32, #tpu.memory_space<vmem>>, vector<10x8x8xf32>
    %31 = vector.shape_cast %30 : vector<10x8x8xf32> to vector<80x8xf32>
    %c16 = arith.constant 16 : index
    %c0_41 = arith.constant 0 : index
    %32 = vector.load %arg5[%c16, %c0_41] : memref<72x16xf32, #tpu.memory_space<vmem>>, vector<8x16xf32>
    %cst_42 = arith.constant dense<0.000000e+00> : vector<80x16xf32>
    %33 = tpu.matmul %31, %32, %cst_42 {dimension_numbers = #tpu.dot_dimension_numbers<[1], [0], [0], [1], [0, 0, 1, 1], [], []>} : vector<80x8xf32>, vector<8x16xf32>, vector<80x16xf32> -> vector<80x16xf32>
    %34 = arith.addf %29, %33 : vector<80x16xf32>
    %c1_43 = arith.constant 1 : index
    %c0_44 = arith.constant 0 : index
    %c0_45 = arith.constant 0 : index
    %35 = vector.load %arg8[%c1_43, %c0_44, %c0_45] : memref<12x10x8xf32, #tpu.memory_space<vmem>>, vector<10x8x8xf32>
    %36 = vector.shape_cast %35 : vector<10x8x8xf32> to vector<80x8xf32>
    %c24 = arith.constant 24 : index
    %c0_46 = arith.constant 0 : index
    %37 = vector.load %arg5[%c24, %c0_46] : memref<72x16xf32, #tpu.memory_space<vmem>>, vector<8x16xf32>
    %cst_47 = arith.constant dense<0.000000e+00> : vector<80x16xf32>
    %38 = tpu.matmul %36, %37, %cst_47 {dimension_numbers = #tpu.dot_dimension_numbers<[1], [0], [0], [1], [0, 0, 1, 1], [], []>} : vector<80x8xf32>, vector<8x16xf32>, vector<80x16xf32> -> vector<80x16xf32>
    %39 = arith.addf %34, %38 : vector<80x16xf32>
    %c1_48 = arith.constant 1 : index
    %c1_49 = arith.constant 1 : index
    %c0_50 = arith.constant 0 : index
    %40 = vector.load %arg8[%c1_48, %c1_49, %c0_50] : memref<12x10x8xf32, #tpu.memory_space<vmem>>, vector<10x8x8xf32>
    %41 = vector.shape_cast %40 : vector<10x8x8xf32> to vector<80x8xf32>
    %c32 = arith.constant 32 : index
    %c0_51 = arith.constant 0 : index
    %42 = vector.load %arg5[%c32, %c0_51] : memref<72x16xf32, #tpu.memory_space<vmem>>, vector<8x16xf32>
    %cst_52 = arith.constant dense<0.000000e+00> : vector<80x16xf32>
    %43 = tpu.matmul %41, %42, %cst_52 {dimension_numbers = #tpu.dot_dimension_numbers<[1], [0], [0], [1], [0, 0, 1, 1], [], []>} : vector<80x8xf32>, vector<8x16xf32>, vector<80x16xf32> -> vector<80x16xf32>
    %44 = arith.addf %39, %43 : vector<80x16xf32>
    %c1_53 = arith.constant 1 : index
    %c2_54 = arith.constant 2 : index
    %c0_55 = arith.constant 0 : index
    %45 = vector.load %arg8[%c1_53, %c2_54, %c0_55] : memref<12x10x8xf32, #tpu.memory_space<vmem>>, vector<10x8x8xf32>
    %46 = vector.shape_cast %45 : vector<10x8x8xf32> to vector<80x8xf32>
    %c40 = arith.constant 40 : index
    %c0_56 = arith.constant 0 : index
    %47 = vector.load %arg5[%c40, %c0_56] : memref<72x16xf32, #tpu.memory_space<vmem>>, vector<8x16xf32>
    %cst_57 = arith.constant dense<0.000000e+00> : vector<80x16xf32>
    %48 = tpu.matmul %46, %47, %cst_57 {dimension_numbers = #tpu.dot_dimension_numbers<[1], [0], [0], [1], [0, 0, 1, 1], [], []>} : vector<80x8xf32>, vector<8x16xf32>, vector<80x16xf32> -> vector<80x16xf32>
    %49 = arith.addf %44, %48 : vector<80x16xf32>
    %c2_58 = arith.constant 2 : index
    %c0_59 = arith.constant 0 : index
    %c0_60 = arith.constant 0 : index
    %50 = vector.load %arg8[%c2_58, %c0_59, %c0_60] : memref<12x10x8xf32, #tpu.memory_space<vmem>>, vector<10x8x8xf32>
    %51 = vector.shape_cast %50 : vector<10x8x8xf32> to vector<80x8xf32>
    %c48 = arith.constant 48 : index
    %c0_61 = arith.constant 0 : index
    %52 = vector.load %arg5[%c48, %c0_61] : memref<72x16xf32, #tpu.memory_space<vmem>>, vector<8x16xf32>
    %cst_62 = arith.constant dense<0.000000e+00> : vector<80x16xf32>
    %53 = tpu.matmul %51, %52, %cst_62 {dimension_numbers = #tpu.dot_dimension_numbers<[1], [0], [0], [1], [0, 0, 1, 1], [], []>} : vector<80x8xf32>, vector<8x16xf32>, vector<80x16xf32> -> vector<80x16xf32>
    %54 = arith.addf %49, %53 : vector<80x16xf32>
    %c2_63 = arith.constant 2 : index
    %c1_64 = arith.constant 1 : index
    %c0_65 = arith.constant 0 : index
    %55 = vector.load %arg8[%c2_63, %c1_64, %c0_65] : memref<12x10x8xf32, #tpu.memory_space<vmem>>, vector<10x8x8xf32>
    %56 = vector.shape_cast %55 : vector<10x8x8xf32> to vector<80x8xf32>
    %c56 = arith.constant 56 : index
    %c0_66 = arith.constant 0 : index
    %57 = vector.load %arg5[%c56, %c0_66] : memref<72x16xf32, #tpu.memory_space<vmem>>, vector<8x16xf32>
    %cst_67 = arith.constant dense<0.000000e+00> : vector<80x16xf32>
    %58 = tpu.matmul %56, %57, %cst_67 {dimension_numbers = #tpu.dot_dimension_numbers<[1], [0], [0], [1], [0, 0, 1, 1], [], []>} : vector<80x8xf32>, vector<8x16xf32>, vector<80x16xf32> -> vector<80x16xf32>
    %59 = arith.addf %54, %58 : vector<80x16xf32>
    %c2_68 = arith.constant 2 : index
    %c2_69 = arith.constant 2 : index
    %c0_70 = arith.constant 0 : index
    %60 = vector.load %arg8[%c2_68, %c2_69, %c0_70] : memref<12x10x8xf32, #tpu.memory_space<vmem>>, vector<10x8x8xf32>
    %61 = vector.shape_cast %60 : vector<10x8x8xf32> to vector<80x8xf32>
    %c64 = arith.constant 64 : index
    %c0_71 = arith.constant 0 : index
    %62 = vector.load %arg5[%c64, %c0_71] : memref<72x16xf32, #tpu.memory_space<vmem>>, vector<8x16xf32>
    %cst_72 = arith.constant dense<0.000000e+00> : vector<80x16xf32>
    %63 = tpu.matmul %61, %62, %cst_72 {dimension_numbers = #tpu.dot_dimension_numbers<[1], [0], [0], [1], [0, 0, 1, 1], [], []>} : vector<80x8xf32>, vector<8x16xf32>, vector<80x16xf32> -> vector<80x16xf32>
    %64 = arith.addf %59, %63 : vector<80x16xf32>
    %c0_73 = arith.constant 0 : index
    %c0_74 = arith.constant 0 : index
    %65 = vector.load %arg6[%c0_73, %c0_74] : memref<1x16xf32, #tpu.memory_space<vmem>>, vector<1x16xf32>
    %66 = vector.broadcast %65 : vector<1x16xf32> to vector<80x16xf32>
    %67 = arith.addf %64, %66 : vector<80x16xf32>
    %cst_75 = arith.constant 0.000000e+00 : f32
    %68 = vector.broadcast %cst_75 : f32 to vector<80x16xf32>
    %69 = arith.maximumf %67, %68 : vector<80x16xf32>
    %70 = vector.shape_cast %69 : vector<80x16xf32> to vector<10x8x16xf32>
    %c0_76 = arith.constant 0 : index
    %c1_77 = arith.constant 1 : index
    %c0_78 = arith.constant 0 : index
    %71 = vector.load %arg9[%c0_76, %c1_77, %c0_78] : memref<10x10x16xf32, #tpu.memory_space<vmem>>, vector<10x8x16xf32>
    tpu.vector_store %arg9[%c0_76, %c1_77, %c0_78], %70 {strides = array<i32>} : memref<10x10x16xf32, #tpu.memory_space<vmem>>, vector<10x8x16xf32>,
    %72 = vector.extract_strided_slice %70 {offsets = [0, 0, 0], sizes = [10, 1, 16], strides = [1, 1, 1]} : vector<10x8x16xf32> to vector<10x1x16xf32>
    %c0_79 = arith.constant 0 : index
    %c0_80 = arith.constant 0 : index
    %c0_81 = arith.constant 0 : index
    %73 = vector.load %arg9[%c0_79, %c0_80, %c0_81] : memref<10x10x16xf32, #tpu.memory_space<vmem>>, vector<10x1x16xf32>
    tpu.vector_store %arg9[%c0_79, %c0_80, %c0_81], %72 {strides = array<i32>} : memref<10x10x16xf32, #tpu.memory_space<vmem>>, vector<10x1x16xf32>,
    %74 = vector.extract_strided_slice %70 {offsets = [0, 7, 0], sizes = [10, 1, 16], strides = [1, 1, 1]} : vector<10x8x16xf32> to vector<10x1x16xf32>
    %c0_82 = arith.constant 0 : index
    %c9_83 = arith.constant 9 : index
    %c0_84 = arith.constant 0 : index
    %75 = vector.load %arg9[%c0_82, %c9_83, %c0_84] : memref<10x10x16xf32, #tpu.memory_space<vmem>>, vector<10x1x16xf32>
    tpu.vector_store %arg9[%c0_82, %c9_83, %c0_84], %74 {strides = array<i32>} : memref<10x10x16xf32, #tpu.memory_space<vmem>>, vector<10x1x16xf32>,
    %c0_i32_85 = arith.constant 0 : i32
    %76 = arith.cmpi eq, %arg1, %c0_i32_85 : i32
    %77 = arith.extui %76 : i1 to i32
    %c0_i32_86 = arith.constant 0 : i32
    %78 = arith.cmpi ne, %77, %c0_i32_86 : i32
    scf.if %78 {
      %c1_130 = arith.constant 1 : index
      %c0_131 = arith.constant 0 : index
      %c0_132 = arith.constant 0 : index
      %135 = vector.load %arg9[%c1_130, %c0_131, %c0_132] : memref<10x10x16xf32, #tpu.memory_space<vmem>>, vector<1x10x16xf32>
      %c0_133 = arith.constant 0 : index
      %c0_134 = arith.constant 0 : index
      %c0_135 = arith.constant 0 : index
      %136 = vector.load %arg9[%c0_133, %c0_134, %c0_135] : memref<10x10x16xf32, #tpu.memory_space<vmem>>, vector<1x10x16xf32>
      tpu.vector_store %arg9[%c0_133, %c0_134, %c0_135], %135 {strides = array<i32>} : memref<10x10x16xf32, #tpu.memory_space<vmem>>, vector<1x10x16xf32>,
    } else {
    }
    %c0_i32_87 = arith.constant 0 : i32
    %79 = arith.cmpi eq, %arg1, %c0_i32_87 : i32
    %80 = arith.extui %79 : i1 to i32
    %c0_i32_88 = arith.constant 0 : i32
    %81 = arith.cmpi ne, %80, %c0_i32_88 : i32
    scf.if %81 {
      %c8_130 = arith.constant 8 : index
      %c0_131 = arith.constant 0 : index
      %c0_132 = arith.constant 0 : index
      %135 = vector.load %arg9[%c8_130, %c0_131, %c0_132] : memref<10x10x16xf32, #tpu.memory_space<vmem>>, vector<1x10x16xf32>
      %c9_133 = arith.constant 9 : index
      %c0_134 = arith.constant 0 : index
      %c0_135 = arith.constant 0 : index
      %136 = vector.load %arg9[%c9_133, %c0_134, %c0_135] : memref<10x10x16xf32, #tpu.memory_space<vmem>>, vector<1x10x16xf32>
      tpu.vector_store %arg9[%c9_133, %c0_134, %c0_135], %135 {strides = array<i32>} : memref<10x10x16xf32, #tpu.memory_space<vmem>>, vector<1x10x16xf32>,
    } else {
    }
    %c1_89 = arith.constant 1 : index
    %c0_90 = arith.constant 0 : index
    %c0_91 = arith.constant 0 : index
    %82 = vector.load %arg9[%c1_89, %c0_90, %c0_91] : memref<10x10x16xf32, #tpu.memory_space<vmem>>, vector<8x10x16xf32>
    %cst_92 = arith.constant 7.500000e-01 : f32
    %83 = vector.broadcast %cst_92 : f32 to vector<8x10x16xf32>
    %84 = arith.mulf %83, %82 : vector<8x10x16xf32>
    %c0_93 = arith.constant 0 : index
    %c0_94 = arith.constant 0 : index
    %c0_95 = arith.constant 0 : index
    %85 = vector.load %arg9[%c0_93, %c0_94, %c0_95] : memref<10x10x16xf32, #tpu.memory_space<vmem>>, vector<8x10x16xf32>
    %cst_96 = arith.constant 2.500000e-01 : f32
    %86 = vector.broadcast %cst_96 : f32 to vector<8x10x16xf32>
    %87 = arith.mulf %86, %85 : vector<8x10x16xf32>
    %88 = arith.addf %84, %87 : vector<8x10x16xf32>
    %cst_97 = arith.constant 7.500000e-01 : f32
    %89 = vector.broadcast %cst_97 : f32 to vector<8x10x16xf32>
    %90 = arith.mulf %89, %82 : vector<8x10x16xf32>
    %c2_98 = arith.constant 2 : index
    %c0_99 = arith.constant 0 : index
    %c0_100 = arith.constant 0 : index
    %91 = vector.load %arg9[%c2_98, %c0_99, %c0_100] : memref<10x10x16xf32, #tpu.memory_space<vmem>>, vector<8x10x16xf32>
    %cst_101 = arith.constant 2.500000e-01 : f32
    %92 = vector.broadcast %cst_101 : f32 to vector<8x10x16xf32>
    %93 = arith.mulf %92, %91 : vector<8x10x16xf32>
    %94 = arith.addf %90, %93 : vector<8x10x16xf32>
    %95 = vector.extract_strided_slice %88 {offsets = [0, 1, 0], sizes = [8, 8, 16], strides = [1, 1, 1]} : vector<8x10x16xf32> to vector<8x8x16xf32>
    %cst_102 = arith.constant 7.500000e-01 : f32
    %96 = vector.broadcast %cst_102 : f32 to vector<8x8x16xf32>
    %97 = arith.mulf %96, %95 : vector<8x8x16xf32>
    %98 = vector.extract_strided_slice %88 {offsets = [0, 0, 0], sizes = [8, 8, 16], strides = [1, 1, 1]} : vector<8x10x16xf32> to vector<8x8x16xf32>
    %cst_103 = arith.constant 2.500000e-01 : f32
    %99 = vector.broadcast %cst_103 : f32 to vector<8x8x16xf32>
    %100 = arith.mulf %99, %98 : vector<8x8x16xf32>
    %101 = arith.addf %97, %100 : vector<8x8x16xf32>
    %c0_104 = arith.constant 0 : index
    %c0_105 = arith.constant 0 : index
    %c0_106 = arith.constant 0 : index
    %c0_107 = arith.constant 0 : index
    %c0_108 = arith.constant 0 : index
    %102 = vector.load %arg7[%c0_104, %c0_105, %c0_106, %c0_107, %c0_108] : memref<1x8x2x8x32xf32, #tpu.memory_space<vmem>>, vector<1x8x1x8x16xf32>
    %103 = vector.shape_cast %102 : vector<1x8x1x8x16xf32> to vector<8x8x16xf32>
    %104 = vector.shape_cast %101 : vector<8x8x16xf32> to vector<1x8x1x8x16xf32>
    tpu.vector_store %arg7[%c0_104, %c0_105, %c0_106, %c0_107, %c0_108], %104 {strides = array<i32>} : memref<1x8x2x8x32xf32, #tpu.memory_space<vmem>>, vector<1x8x1x8x16xf32>,
    %105 = vector.extract_strided_slice %88 {offsets = [0, 1, 0], sizes = [8, 8, 16], strides = [1, 1, 1]} : vector<8x10x16xf32> to vector<8x8x16xf32>
    %cst_109 = arith.constant 7.500000e-01 : f32
    %106 = vector.broadcast %cst_109 : f32 to vector<8x8x16xf32>
    %107 = arith.mulf %106, %105 : vector<8x8x16xf32>
    %108 = vector.extract_strided_slice %88 {offsets = [0, 2, 0], sizes = [8, 8, 16], strides = [1, 1, 1]} : vector<8x10x16xf32> to vector<8x8x16xf32>
    %cst_110 = arith.constant 2.500000e-01 : f32
    %109 = vector.broadcast %cst_110 : f32 to vector<8x8x16xf32>
    %110 = arith.mulf %109, %108 : vector<8x8x16xf32>
    %111 = arith.addf %107, %110 : vector<8x8x16xf32>
    %c0_111 = arith.constant 0 : index
    %c0_112 = arith.constant 0 : index
    %c0_113 = arith.constant 0 : index
    %c0_114 = arith.constant 0 : index
    %c16_115 = arith.constant 16 : index
    %112 = vector.load %arg7[%c0_111, %c0_112, %c0_113, %c0_114, %c16_115] : memref<1x8x2x8x32xf32, #tpu.memory_space<vmem>>, vector<1x8x1x8x16xf32>
    %113 = vector.shape_cast %112 : vector<1x8x1x8x16xf32> to vector<8x8x16xf32>
    %114 = vector.shape_cast %111 : vector<8x8x16xf32> to vector<1x8x1x8x16xf32>
    tpu.vector_store %arg7[%c0_111, %c0_112, %c0_113, %c0_114, %c16_115], %114 {strides = array<i32>} : memref<1x8x2x8x32xf32, #tpu.memory_space<vmem>>, vector<1x8x1x8x16xf32>,
    %115 = vector.extract_strided_slice %94 {offsets = [0, 1, 0], sizes = [8, 8, 16], strides = [1, 1, 1]} : vector<8x10x16xf32> to vector<8x8x16xf32>
    %cst_116 = arith.constant 7.500000e-01 : f32
    %116 = vector.broadcast %cst_116 : f32 to vector<8x8x16xf32>
    %117 = arith.mulf %116, %115 : vector<8x8x16xf32>
    %118 = vector.extract_strided_slice %94 {offsets = [0, 0, 0], sizes = [8, 8, 16], strides = [1, 1, 1]} : vector<8x10x16xf32> to vector<8x8x16xf32>
    %cst_117 = arith.constant 2.500000e-01 : f32
    %119 = vector.broadcast %cst_117 : f32 to vector<8x8x16xf32>
    %120 = arith.mulf %119, %118 : vector<8x8x16xf32>
    %121 = arith.addf %117, %120 : vector<8x8x16xf32>
    %c0_118 = arith.constant 0 : index
    %c0_119 = arith.constant 0 : index
    %c1_120 = arith.constant 1 : index
    %c0_121 = arith.constant 0 : index
    %c0_122 = arith.constant 0 : index
    %122 = vector.load %arg7[%c0_118, %c0_119, %c1_120, %c0_121, %c0_122] : memref<1x8x2x8x32xf32, #tpu.memory_space<vmem>>, vector<1x8x1x8x16xf32>
    %123 = vector.shape_cast %122 : vector<1x8x1x8x16xf32> to vector<8x8x16xf32>
    %124 = vector.shape_cast %121 : vector<8x8x16xf32> to vector<1x8x1x8x16xf32>
    tpu.vector_store %arg7[%c0_118, %c0_119, %c1_120, %c0_121, %c0_122], %124 {strides = array<i32>} : memref<1x8x2x8x32xf32, #tpu.memory_space<vmem>>, vector<1x8x1x8x16xf32>,
    %125 = vector.extract_strided_slice %94 {offsets = [0, 1, 0], sizes = [8, 8, 16], strides = [1, 1, 1]} : vector<8x10x16xf32> to vector<8x8x16xf32>
    %cst_123 = arith.constant 7.500000e-01 : f32
    %126 = vector.broadcast %cst_123 : f32 to vector<8x8x16xf32>
    %127 = arith.mulf %126, %125 : vector<8x8x16xf32>
    %128 = vector.extract_strided_slice %94 {offsets = [0, 2, 0], sizes = [8, 8, 16], strides = [1, 1, 1]} : vector<8x10x16xf32> to vector<8x8x16xf32>
    %cst_124 = arith.constant 2.500000e-01 : f32
    %129 = vector.broadcast %cst_124 : f32 to vector<8x8x16xf32>
    %130 = arith.mulf %129, %128 : vector<8x8x16xf32>
    %131 = arith.addf %127, %130 : vector<8x8x16xf32>
    %c0_125 = arith.constant 0 : index
    %c0_126 = arith.constant 0 : index
    %c1_127 = arith.constant 1 : index
    %c0_128 = arith.constant 0 : index
    %c16_129 = arith.constant 16 : index
    %132 = vector.load %arg7[%c0_125, %c0_126, %c1_127, %c0_128, %c16_129] : memref<1x8x2x8x32xf32, #tpu.memory_space<vmem>>, vector<1x8x1x8x16xf32>
    %133 = vector.shape_cast %132 : vector<1x8x1x8x16xf32> to vector<8x8x16xf32>
    %134 = vector.shape_cast %131 : vector<8x8x16xf32> to vector<1x8x1x8x16xf32>
    tpu.vector_store %arg7[%c0_125, %c0_126, %c1_127, %c0_128, %c16_129], %134 {strides = array<i32>} : memref<1x8x2x8x32xf32, #tpu.memory_space<vmem>>, vector<1x8x1x8x16xf32>,
    return
  }
  func.func @transform_0(%arg0: i32, %arg1: i32) -> (i32, i32, i32, i32) {
    %c0_i32 = arith.constant 0 : i32
    %c0_i32_0 = arith.constant 0 : i32
    %c0_i32_1 = arith.constant 0 : i32
    return %arg0, %arg1, %c0_i32, %c0_i32_0 : i32, i32, i32, i32
  }
  func.func @transform_1(%arg0: i32, %arg1: i32) -> (i32, i32, i32, i32) {
    %c4_i32 = arith.constant 4 : i32
    %0 = arith.muli %arg1, %c4_i32 : i32
    %c1_i32 = arith.constant 1 : i32
    %1 = arith.subi %0, %c1_i32 : i32
    %c0_i32 = arith.constant 0 : i32
    %2 = arith.maxsi %1, %c0_i32 : i32
    %c0_i32_0 = arith.constant 0 : i32
    %c0_i32_1 = arith.constant 0 : i32
    %c0_i32_2 = arith.constant 0 : i32
    return %arg0, %2, %c0_i32_0, %c0_i32_1 : i32, i32, i32, i32
  }
  func.func @transform_2(%arg0: i32, %arg1: i32) -> (i32, i32, i32, i32) {
    %c1_i32 = arith.constant 1 : i32
    %0 = arith.addi %arg1, %c1_i32 : i32
    %c4_i32 = arith.constant 4 : i32
    %1 = arith.muli %0, %c4_i32 : i32
    %c3_i32 = arith.constant 3 : i32
    %2 = arith.minsi %1, %c3_i32 : i32
    %c0_i32 = arith.constant 0 : i32
    %c0_i32_0 = arith.constant 0 : i32
    %c0_i32_1 = arith.constant 0 : i32
    return %arg0, %2, %c0_i32, %c0_i32_0 : i32, i32, i32, i32
  }
  func.func @transform_3(%arg0: i32, %arg1: i32) -> (i32, i32) {
    %c0_i32 = arith.constant 0 : i32
    %c0_i32_0 = arith.constant 0 : i32
    %c0_i32_1 = arith.constant 0 : i32
    return %c0_i32, %c0_i32_0 : i32, i32
  }
  func.func @transform_4(%arg0: i32, %arg1: i32) -> (i32, i32) {
    %c0_i32 = arith.constant 0 : i32
    %c0_i32_0 = arith.constant 0 : i32
    %c0_i32_1 = arith.constant 0 : i32
    return %c0_i32, %c0_i32_0 : i32, i32
  }
  func.func @transform_5(%arg0: i32, %arg1: i32) -> (i32, i32, i32, i32, i32) {
    %c0_i32 = arith.constant 0 : i32
    %c0_i32_0 = arith.constant 0 : i32
    %c0_i32_1 = arith.constant 0 : i32
    %c0_i32_2 = arith.constant 0 : i32
    return %arg0, %arg1, %c0_i32, %c0_i32_0, %c0_i32_1 : i32, i32, i32, i32, i32
  }
}

</mosaic_0001>

<bundles_post_ra>
// kernel: upsample_block_3d.1
= control target key start
LH: loop header
LB: loop body
LE: loop exit
PB: predicated region body
PF: predicated region fallthrough
CT: control target
= control target key end

     0   :  { %s2350_s18 = smov 0   ;;  %s2352_s19 = smov 0   ;;  %s3173_s0 = inlined_call_operand.vmem [shape: f32[8,8,8,8], index: 0, kind: input, shape index: {}, may-alias: {0,1,2}]   ;;  %s3174_s1 = inlined_call_operand.vmem [shape: f32[8,8,8,8], index: 1, kind: input, shape index: {}, may-alias: {0,1,2}]   ;;  %s3175_s2 = inlined_call_operand.vmem [shape: f32[8,8,8,8], index: 2, kind: input, shape index: {}, may-alias: {0,1,2}]   ;;  %s3176_s3 = inlined_call_operand.vmem [shape: f32[72,16], index: 3, kind: input, shape index: {}]   ;;  %s3177_s4 = inlined_call_operand.vmem [shape: f32[1,16], index: 4, kind: input, shape index: {}]   ;;  %s3178_s5 = inlined_call_operand.vmem [shape: f32[8,8,2,8,32], index: 5, kind: output, shape index: {}]  }
   0x1   :  { %s2354_s20 = smov 0  }
   0x2 LB: > { %s27_s1 = sadd.s32 1, %s2312_s19  ;;  %p2126_p0 = scmp.ge.s32.totalorder %s2316_s20, 1  ;;  %s2316_s20 = sphi %s2354_s20, %s15_s20   ;;  %s2312_s19 = sphi %s2352_s19, %s3186_s19   ;;  %s2308_s18 = sphi %s2350_s18, %s3185_s18  }
   0x3   : > { %p29_p1 = scmp.ge.s32.totalorder %s27_s1, 8  ;;  %p274_p2 = scmp.lt.s32.totalorder %s2316_s20, 9 }
   0x5   : > { %s3188_s1 = smov (%p29_p1, %s27_s1), 0  ;;  %p275_p3 = pnand %p2126_p0, %p274_p2 }
   0x6   : > { %p338_p4 = scmp.lt.s32.totalorder (!%p275_p3), %s2308_s18, 7  ;;  %s2319_s24 = smov (!%p275_p3), 16  }
   0x7   : > { %278 = sbr.rel (%p275_p3) target bundleno = 513 (0x201), region = 40 }
   0xc   : > { %v479_v0 = vld [vmem:[%s3176_s3 + $0x8] sm:$0xff]  ;;  %vm428_vm0 = vcmask 64512   ;;  %v743_v1 = vld [vmem:[%s3176_s3 + $0x18] sm:$0xff]  ;;  %v468_v2 = vld [vmem:[%s3176_s3] sm:$0xff]  ;;  %v2318_v3 = vmov 0.0   ;;  %s3190_s18 = smov (!%p338_p4, %s2308_s18), 7 }
   0xd   : > { %2264 = vmatpush.msra.mxu1 %v479_v0  ;;  %2266 = vmatpush.msra.mxu3 %v479_v0  ;;  %447 = vst.msk [vmem:[#allocation2 + $0x1] sm:$0xff] %vm428_vm0, %v2318_v3  ;;  %v841_v4 = vld [vmem:[%s3176_s3 + $0x20] sm:$0xff]  ;;  %v644_v5 = vld [vmem:[%s3176_s3 + $0x10] sm:$0xff]  ;;  %vm394_vm1 = vcmask 57344   ;;  %s2259_s30 = sshll.u32 %s3190_s18, 6  ;;  %v939_v14 = vld [vmem:[%s3176_s3 + $0x28] sm:$0xff] }
   0xe   : > { %448 = vst.msk [vmem:[#allocation2 + $0x11] sm:$0xff] %vm428_vm0, %v2318_v3  ;;  %525 = vmatpush.msra.mxu0 %v479_v0  ;;  %2265 = vmatpush.msra.mxu2 %v479_v0  ;;  %s2397_s8 = scalar_lea.vmem %s3173_s0, %s2259_s30  ;;  %v1135_v17 = vld [vmem:[%s3176_s3 + $0x38] sm:$0xff]  ;;  %v1037_v19 = vld [vmem:[%s3176_s3 + $0x30] sm:$0xff]  ;;  %v1233_v22 = vld [vmem:[%s3176_s3 + $0x40] sm:$0xff]  ;;  %vm1345_vm2 = vcmask 130048   ;;  %vm1356_vm3 = vcmask 122880  }
   0xf   : > { %789 = vmatpush.msrb.mxu3 %v743_v1  ;;  %602 = vmatpush.msrb.mxu1 %v468_v2  ;;  %456 = vst.msk [vmem:[#allocation2 + $0xa1] sm:$0xff] %vm428_vm0, %v2318_v3  ;;  %v420_v6 = vld [vmem:[%s2397_s8 + $0x8] sm:$0xff]  ;;  %v421_v8 = vld [vmem:[%s2397_s8 + $0x10] sm:$0xff]  ;;  %v423_v11 = vld [vmem:[%s2397_s8 + $0x20] sm:$0xff]  ;;  %vm1367_vm4 = vcmask 130055   ;;  %vm1386_vm5 = vcmask 123904  }
  0x10   : > { %457 = vst.msk [vmem:[#allocation2 + $0xb1] sm:$0xff] %vm428_vm0, %v2318_v3  ;;  %887 = vmatpush.msrb.mxu0 %v841_v4  ;;  %690 = vmatpush.msrb.mxu2 %v644_v5  ;;  %v424_v7 = vld [vmem:[%s2397_s8 + $0x28] sm:$0xff]  ;;  %v425_v9 = vld [vmem:[%s2397_s8 + $0x30] sm:$0xff]  ;;  %v422_v12 = vld [vmem:[%s2397_s8 + $0x18] sm:$0xff]  ;;  %s2263_s21 = sshll.u32 %s3190_s18, 7  ;;  %vm1621_vm6 = vcmask 1046528  }
  0x11   : > { %407 = vst.msk [vmem:[#allocation2 + $0x9] sm:$0x1] %vm394_vm1, %v2318_v3  ;;  %v426_v13 = vld [vmem:[%s2397_s8 + $0x38] sm:$0xff]  ;;  %v419_v28 = vld [vmem:[%s2397_s8] sm:$0xff]  ;;  %s2726_s23 = scalar_lea.vmem %s3178_s5, %s2263_s21  ;;  %vm1588_vm7 = vcmask 130049   ;;  %vm1744_vm8 = vcmask 254080  }
  0x12   : > { %395 = vst.msk [vmem:[#allocation2] sm:$0x1] %vm394_vm1, %v2318_v3  ;;  %vm1742_vm9 = vcmask 261249  }
  0x13   : > { %430 = vst.msk [vmem:[#allocation2 + $0x31] sm:$0xff] %vm428_vm0, %v420_v6 }
  0x14   : > { %434 = vst.msk [vmem:[#allocation2 + $0x71] sm:$0xff] %vm428_vm0, %v424_v7  ;;  %v469_v10 = vld [vmem:[#allocation2 + $0x1] sm:$0xff] }
  0x15   : > { %2135 = vmatmul.msk.f32.vlgmr.msra.gmra.mxu0 %vm428_vm0, %v469_v10  ;;  %431 = vst.msk [vmem:[#allocation2 + $0x41] sm:$0xff] %vm428_vm0, %v421_v8  ;;  %v470_v16 = vld [vmem:[#allocation2 + $0x11] sm:$0xff] }
  0x16   : > { %435 = vst.msk [vmem:[#allocation2 + $0x81] sm:$0xff] %vm428_vm0, %v425_v9  ;;  %1279 = vmatpush.msra.mxu0 %v1233_v22  ;;  %v840_v49 = vld [vmem:[#allocation2 + $0xa1] sm:$0xff] }
  0x17   : > { %433 = vst.msk [vmem:[#allocation2 + $0x61] sm:$0xff] %vm428_vm0, %v423_v11 }
  0x18   : > { %432 = vst.msk [vmem:[#allocation2 + $0x51] sm:$0xff] %vm428_vm0, %v422_v12  ;;  %v634_v24 = vld [vmem:[#allocation2 + $0x2] sm:$0xff] }
  0x19   : > { %436 = vst.msk [vmem:[#allocation2 + $0x91] sm:$0xff] %vm428_vm0, %v426_v13  ;;  %v458_v29 = vld [vmem:[#allocation2] sm:$0xff] }
  0x1a   : > { %v2421_v15 = vld [vmem:[#allocation2 + $0x31] sm:$0xff]  ;;  %396 = vst.msk [vmem:[#allocation2 + $0x10] sm:$0x1] %vm394_vm1, %v2318_v3 }
  0x1b   : > { %2138 = vmatmul.msk.f32.vlgmr.msra.gmra.mxu1 %vm428_vm0, %v2421_v15  ;;  %v2430_v18 = vld [vmem:[#allocation2 + $0x71] sm:$0xff]  ;;  %397 = vst.msk [vmem:[#allocation2 + $0x20] sm:$0x1] %vm394_vm1, %v2318_v3 }
  0x1c   : > { %2142 = vmatmul.msk.f32.vlgmr.msra.gmra.mxu3 %vm428_vm0, %v2430_v18  ;;  %398 = vst.msk [vmem:[#allocation2 + $0x30] sm:$0x1] %vm394_vm1, %v2318_v3  ;;  %985 = vmatpush.msra.mxu1 %v939_v14  ;;  %v2452_v21 = vld [vmem:[#allocation2 + $0x41] sm:$0xff] }
  0x1d   : > { %2136 = vmatmul.msk.f32.gmra.mxu0 %vm428_vm0, %v470_v16  ;;  %399 = vst.msk [vmem:[#allocation2 + $0x40] sm:$0x1] %vm394_vm1, %v2318_v3  ;;  %1181 = vmatpush.msra.mxu3 %v1135_v17  ;;  %v2459_v23 = vld [vmem:[#allocation2 + $0x81] sm:$0xff] }
  0x1e   : > { %v2444_v20 = vld [vmem:[#allocation2 + $0x61] sm:$0xff]  ;;  %400 = vst.msk [vmem:[#allocation2 + $0x50] sm:$0x1] %vm394_vm1, %v2318_v3 }
  0x1f   : > { %2141 = vmatmul.msk.f32.vlgmr.msra.gmra.mxu2 %vm428_vm0, %v2444_v20  ;;  %401 = vst.msk [vmem:[#allocation2 + $0x60] sm:$0x1] %vm394_vm1, %v2318_v3  ;;  %v2480_v25 = vld [vmem:[#allocation2 + $0x51] sm:$0xff] }
  0x20   : > { %402 = vst.msk [vmem:[#allocation2 + $0x70] sm:$0x1] %vm394_vm1, %v2318_v3  ;;  %1083 = vmatpush.msra.mxu2 %v1037_v19  ;;  %v2484_v26 = vld [vmem:[#allocation2 + $0x91] sm:$0xff] }
  0x21   : > { %403 = vst.msk [vmem:[#allocation2 + $0x80] sm:$0x1] %vm394_vm1, %v2318_v3  ;;  %v733_v30 = vld [vmem:[#allocation2 + $0x10] sm:$0xff] }
  0x22   : > { %404 = vst.msk [vmem:[#allocation2 + $0x90] sm:$0x1] %vm394_vm1, %v2318_v3 }
  0x23   : > { %2139 = vmatmul.msk.f32.gmra.mxu1 %vm428_vm0, %v2452_v21  ;;  %405 = vst.msk [vmem:[#allocation2 + $0xa0] sm:$0x1] %vm394_vm1, %v2318_v3  ;;  %v735_v35 = vld [vmem:[#allocation2 + $0x30] sm:$0xff] }
  0x24   : > { %2143 = vmatmul.msk.f32.gmra.mxu3 %vm428_vm0, %v2459_v23  ;;  %406 = vst.msk [vmem:[#allocation2 + $0xb0] sm:$0x1] %vm394_vm1, %v2318_v3  ;;  %v736_v37 = vld [vmem:[#allocation2 + $0x40] sm:$0xff] }
  0x25   : > { %408 = vst.msk [vmem:[#allocation2 + $0x19] sm:$0x1] %vm394_vm1, %v2318_v3  ;;  %v737_v39 = vld [vmem:[#allocation2 + $0x50] sm:$0xff] }
  0x26   : > { %409 = vst.msk [vmem:[#allocation2 + $0x29] sm:$0x1] %vm394_vm1, %v2318_v3  ;;  %v738_v41 = vld [vmem:[#allocation2 + $0x60] sm:$0xff] }
  0x27   : > { %2155 = vmatmul.msk.f32.vlgmr.msrb.gmra.mxu2 %vm428_vm0, %v634_v24  ;;  %410 = vst.msk [vmem:[#allocation2 + $0x39] sm:$0x1] %vm394_vm1, %v2318_v3  ;;  %v739_v43 = vld [vmem:[#allocation2 + $0x70] sm:$0xff] }
  0x28   : > { %411 = vst.msk [vmem:[#allocation2 + $0x49] sm:$0x1] %vm394_vm1, %v2318_v3  ;;  %v740_v45 = vld [vmem:[#allocation2 + $0x80] sm:$0xff] }
  0x29   : > { %412 = vst.msk [vmem:[#allocation2 + $0x59] sm:$0x1] %vm394_vm1, %v2318_v3  ;;  %v741_v47 = vld [vmem:[#allocation2 + $0x90] sm:$0xff] }
  0x2a   : > { %413 = vst.msk [vmem:[#allocation2 + $0x69] sm:$0x1] %vm394_vm1, %v2318_v3  ;;  %v742_v48 = vld [vmem:[#allocation2 + $0xa0] sm:$0xff] }
  0x2b   : > { %2140 = vmatmul.msk.f32.gmra.mxu1 %vm428_vm0, %v2480_v25  ;;  %414 = vst.msk [vmem:[#allocation2 + $0x79] sm:$0x1] %vm394_vm1, %v2318_v3  ;;  %v1036_v8 = vld [vmem:[#allocation2 + $0xb0] sm:$0xff] }
  0x2c   : > { %2144 = vmatmul.msk.f32.gmra.mxu3 %vm428_vm0, %v2484_v26  ;;  %415 = vst.msk [vmem:[#allocation2 + $0x89] sm:$0x1] %vm394_vm1, %v2318_v3  ;;  %v2498_v27 = vld [vmem:[#allocation2 + $0x12] sm:$0xff] }
  0x2d   : > { %416 = vst.msk [vmem:[#allocation2 + $0x99] sm:$0x1] %vm394_vm1, %v2318_v3 }
  0x2e   : > { %417 = vst.msk [vmem:[#allocation2 + $0xa9] sm:$0x1] %vm394_vm1, %v2318_v3  ;;  %v637_v34 = vld [vmem:[#allocation2 + $0x32] sm:$0xff] }
  0x2f   : > { %418 = vst.msk [vmem:[#allocation2 + $0xb9] sm:$0x1] %vm394_vm1, %v2318_v3  ;;  %2156 = vmatmul.msk.f32.gmra.mxu2 %vm428_vm0, %v2498_v27  ;;  %v638_v36 = vld [vmem:[#allocation2 + $0x42] sm:$0xff] }
  0x30   : > { %429 = vst.msk [vmem:[#allocation2 + $0x21] sm:$0xff] %vm428_vm0, %v419_v28  ;;  %v639_v38 = vld [vmem:[#allocation2 + $0x52] sm:$0xff] }
  0x31   : > { %v2529_v40 = vld [vmem:[#allocation2 + $0x62] sm:$0xff] }
  0x32   : > { %v2537_v42 = vld [vmem:[#allocation2 + $0x72] sm:$0xff] }
  0x33   : > { %2145 = vmatmul.msk.f32.vlgmr.msrb.gmra.mxu1 %vm428_vm0, %v458_v29  ;;  %v2545_v44 = vld [vmem:[#allocation2 + $0x82] sm:$0xff] }
  0x34   : > { %2165 = vmatmul.msk.f32.vlgmr.msrb.gmra.mxu3 %vm428_vm0, %v733_v30  ;;  %v2553_v46 = vld [vmem:[#allocation2 + $0x92] sm:$0xff] }
  0x37   : > { %v471_v31 = vld [vmem:[#allocation2 + $0x21] sm:$0xff] }
  0x38   : > { %v636_v32 = vld [vmem:[#allocation2 + $0x22] sm:$0xff]  ;;  %2137 = vmatmul.msk.f32.gmra.mxu0 %vm428_vm0, %v471_v31 }
  0x39   : > { %2157 = vmatmul.msk.f32.gmra.mxu2 %vm428_vm0, %v636_v32  ;;  %v734_v33 = vld [vmem:[#allocation2 + $0x20] sm:$0xff] }
  0x3b   : > { %2146 = vmatmul.msk.f32.gmra.mxu1 %vm428_vm0, %v733_v30 }
  0x3c   : > { %2166 = vmatmul.msk.f32.gmra.mxu3 %vm428_vm0, %v734_v33 }
  0x40   : > { %2175 = vmatmul.msk.f32.vlgmr.msrb.gmra.mxu0 %vm428_vm0, %v470_v16 }
  0x41   : > { %2158 = vmatmul.msk.f32.gmra.mxu2 %vm428_vm0, %v637_v34 }
  0x43   : > { %2147 = vmatmul.msk.f32.gmra.mxu1 %vm428_vm0, %v734_v33 }
  0x44   : > { %2167 = vmatmul.msk.f32.gmra.mxu3 %vm428_vm0, %v735_v35 }
  0x48   : > { %2176 = vmatmul.msk.f32.gmra.mxu0 %vm428_vm0, %v471_v31 }
  0x49   : > { %2159 = vmatmul.msk.f32.gmra.mxu2 %vm428_vm0, %v638_v36 }
  0x4b   : > { %2148 = vmatmul.msk.f32.gmra.mxu1 %vm428_vm0, %v735_v35 }
  0x4c   : > { %2168 = vmatmul.msk.f32.gmra.mxu3 %vm428_vm0, %v736_v37 }
  0x50   : > { %2177 = vmatmul.msk.f32.gmra.mxu0 %vm428_vm0, %v2421_v15 }
  0x51   : > { %2160 = vmatmul.msk.f32.gmra.mxu2 %vm428_vm0, %v639_v38 }
  0x53   : > { %2149 = vmatmul.msk.f32.gmra.mxu1 %vm428_vm0, %v736_v37 }
  0x54   : > { %2169 = vmatmul.msk.f32.gmra.mxu3 %vm428_vm0, %v737_v39 }
  0x58   : > { %2178 = vmatmul.msk.f32.gmra.mxu0 %vm428_vm0, %v2452_v21 }
  0x59   : > { %2161 = vmatmul.msk.f32.gmra.mxu2 %vm428_vm0, %v2529_v40 }
  0x5b   : > { %2150 = vmatmul.msk.f32.gmra.mxu1 %vm428_vm0, %v737_v39 }
  0x5c   : > { %2170 = vmatmul.msk.f32.gmra.mxu3 %vm428_vm0, %v738_v41 }
  0x60   : > { %2179 = vmatmul.msk.f32.gmra.mxu0 %vm428_vm0, %v2480_v25 }
  0x61   : > { %2162 = vmatmul.msk.f32.gmra.mxu2 %vm428_vm0, %v2537_v42 }
  0x63   : > { %2151 = vmatmul.msk.f32.gmra.mxu1 %vm428_vm0, %v738_v41 }
  0x64   : > { %2171 = vmatmul.msk.f32.gmra.mxu3 %vm428_vm0, %v739_v43 }
  0x68   : > { %2180 = vmatmul.msk.f32.gmra.mxu0 %vm428_vm0, %v2444_v20 }
  0x69   : > { %2163 = vmatmul.msk.f32.gmra.mxu2 %vm428_vm0, %v2545_v44 }
  0x6b   : > { %2152 = vmatmul.msk.f32.gmra.mxu1 %vm428_vm0, %v739_v43 }
  0x6c   : > { %2172 = vmatmul.msk.f32.gmra.mxu3 %vm428_vm0, %v740_v45 }
  0x70   : > { %2181 = vmatmul.msk.f32.gmra.mxu0 %vm428_vm0, %v2430_v18 }
  0x71   : > { %2164 = vmatmul.msk.f32.gmra.mxu2 %vm428_vm0, %v2553_v46 }
  0x73   : > { %2153 = vmatmul.msk.f32.gmra.mxu1 %vm428_vm0, %v740_v45 }
  0x74   : > { %2173 = vmatmul.msk.f32.gmra.mxu3 %vm428_vm0, %v741_v47 }
  0x78   : > { %2182 = vmatmul.msk.f32.gmra.mxu0 %vm428_vm0, %v2459_v23 }
  0x79   : > { %2195 = vmatmul.msk.f32.vlgmr.msra.gmra.mxu2 %vm428_vm0, %v734_v33 }
  0x7b   : > { %2154 = vmatmul.msk.f32.gmra.mxu1 %vm428_vm0, %v741_v47 }
  0x7c   : > { %2174 = vmatmul.msk.f32.gmra.mxu3 %vm428_vm0, %v742_v48 }
  0x80   : > { %2183 = vmatmul.msk.f32.gmra.mxu0 %vm428_vm0, %v2484_v26 }
  0x81   : > { %2196 = vmatmul.msk.f32.gmra.mxu2 %vm428_vm0, %v735_v35  ;;  %v1232_v35 = vld [vmem:[#allocation2 + $0xb2] sm:$0xff] }
  0x83   : > { %2185 = vmatmul.msk.f32.vlgmr.msra.gmra.mxu1 %vm428_vm0, %v2498_v27 }
  0x84   : > { %2205 = vmatmul.msk.f32.vlgmr.msra.gmra.mxu3 %vm428_vm0, %v471_v31 }
  0x88   : > { %2184 = vmatmul.msk.f32.gmra.mxu0 %vm428_vm0, %v840_v49 }
  0x89   : > { %2197 = vmatmul.msk.f32.gmra.mxu2 %vm428_vm0, %v736_v37 }
  0x8b   : > { %2186 = vmatmul.msk.f32.gmra.mxu1 %vm428_vm0, %v636_v32 }
  0x8c   : > { %2206 = vmatmul.msk.f32.gmra.mxu3 %vm428_vm0, %v2421_v15 }
  0x90   : > { %2215 = vmatmul.msk.f32.vlgmr.msra.gmra.mxu0 %vm428_vm0, %v636_v32 }
  0x91   : > { %2198 = vmatmul.msk.f32.gmra.mxu2 %vm428_vm0, %v737_v39 }
  0x92   : > { %v527_v53 = vpop.f32.mrf.mxu0 }
  0x93   : > { %2187 = vmatmul.msk.f32.gmra.mxu1 %vm428_vm0, %v637_v34 }
  0x94   : > { %2207 = vmatmul.msk.f32.gmra.mxu3 %vm428_vm0, %v2452_v21  ;;  %v938_v21 = vld [vmem:[#allocation2 + $0xa2] sm:$0xff] }
  0x98   : > { %2216 = vmatmul.msk.f32.gmra.mxu0 %vm428_vm0, %v637_v34  ;;  %v536_v50 = vpop.f32.mrf.mxu1 }
  0x99   : > { %2199 = vmatmul.msk.f32.gmra.mxu2 %vm428_vm0, %v738_v41 }
  0x9a   : > { %v530_v58 = vpop.f32.mrf.mxu0 }
  0x9b   : > { %2188 = vmatmul.msk.f32.gmra.mxu1 %vm428_vm0, %v638_v36 }
  0x9c   : > { %2208 = vmatmul.msk.f32.gmra.mxu3 %vm428_vm0, %v2480_v25 }
  0x9f   : > { %v2587_v51 = vpop.f32.mrf.mxu3 }
  0xa0   : > { %2217 = vmatmul.msk.f32.gmra.mxu0 %vm428_vm0, %v638_v36  ;;  %v2590_v52 = vpop.f32.mrf.mxu1 }
  0xa1   : > { %2200 = vmatmul.msk.f32.gmra.mxu2 %vm428_vm0, %v739_v43 }
  0xa2   : > { %v2593_v54 = vpop.f32.mrf.mxu2 }
  0xa3   : > { %2189 = vmatmul.msk.f32.gmra.mxu1 %vm428_vm0, %v639_v38 }
  0xa4   : > { %2209 = vmatmul.msk.f32.gmra.mxu3 %vm428_vm0, %v2444_v20 }
  0xa7   : > { %v2598_v55 = vpop.f32.mrf.mxu3 }
  0xa8   : > { %2218 = vmatmul.msk.f32.gmra.mxu0 %vm428_vm0, %v639_v38  ;;  %v2601_v56 = vpop.f32.mrf.mxu1 }
  0xa9   : > { %2201 = vmatmul.msk.f32.gmra.mxu2 %vm428_vm0, %v740_v45 }
  0xaa   : > { %v692_v57 = vpop.f32.mrf.mxu2 }
  0xab   : > { %2190 = vmatmul.msk.f32.gmra.mxu1 %vm428_vm0, %v2529_v40 }
  0xac   : > { %2210 = vmatmul.msk.f32.gmra.mxu3 %vm428_vm0, %v2430_v18 }
  0xaf   : > { %v2608_v59 = vpop.f32.mrf.mxu3 }
  0xb0   : > { %2219 = vmatmul.msk.f32.gmra.mxu0 %vm428_vm0, %v2529_v40  ;;  %v604_v60 = vpop.f32.mrf.mxu1 }
  0xb1   : > { %2202 = vmatmul.msk.f32.gmra.mxu2 %vm428_vm0, %v741_v47  ;;  %v605_v61 = vadd.f32 %v604_v60, %v527_v53 }
  0xb2   : > { %v695_v62 = vpop.f32.mrf.mxu2 }
  0xb3   : > { %v722_v63 = vadd.f32 %v692_v57, %v605_v61  ;;  %2191 = vmatmul.msk.f32.gmra.mxu1 %vm428_vm0, %v2537_v42 }
  0xb4   : > { %2211 = vmatmul.msk.f32.gmra.mxu3 %vm428_vm0, %v2459_v23  ;;  %v1134_v23 = vld [vmem:[#allocation2 + $0xb1] sm:$0xff] }
  0xb5   : > { %v533_v0 = vpop.f32.mrf.mxu0 }
  0xb7   : > { %v791_v1 = vpop.f32.mrf.mxu3 }
  0xb8   : > { %2220 = vmatmul.msk.f32.gmra.mxu0 %vm428_vm0, %v2537_v42  ;;  %v821_v2 = vadd.f32 %v791_v1, %v722_v63  ;;  %v607_v3 = vpop.f32.mrf.mxu1 }
  0xb9   : > { %2203 = vmatmul.msk.f32.gmra.mxu2 %vm428_vm0, %v742_v48  ;;  %v608_v4 = vadd.f32 %v607_v3, %v530_v58 }
  0xbb   : > { %v723_v5 = vadd.f32 %v695_v62, %v608_v4  ;;  %2192 = vmatmul.msk.f32.gmra.mxu1 %vm428_vm0, %v2545_v44 }
  0xbc   : > { %v698_v6 = vpop.f32.mrf.mxu2  ;;  %2212 = vmatmul.msk.f32.gmra.mxu3 %vm428_vm0, %v2484_v26 }
  0xbd   : > { %v889_v7 = vpop.f32.mrf.mxu0 }
  0xbe   : > { %v2624_v9 = vadd.f32 %v889_v7, %v821_v2 }
  0xbf   : > { %v794_v10 = vpop.f32.mrf.mxu3 }
  0xc0   : > { %2221 = vmatmul.msk.f32.gmra.mxu0 %vm428_vm0, %v2545_v44  ;;  %v822_v11 = vadd.f32 %v794_v10, %v723_v5  ;;  %v610_v12 = vpop.f32.mrf.mxu1 }
  0xc1   : > { %2204 = vmatmul.msk.f32.gmra.mxu2 %vm428_vm0, %v1036_v8  ;;  %v611_v13 = vadd.f32 %v610_v12, %v533_v0 }
  0xc3   : > { %v724_v14 = vadd.f32 %v698_v6, %v611_v13  ;;  %2193 = vmatmul.msk.f32.gmra.mxu1 %vm428_vm0, %v2553_v46 }
  0xc4   : > { %v701_v15 = vpop.f32.mrf.mxu2  ;;  %2213 = vmatmul.msk.f32.gmra.mxu3 %vm428_vm0, %v840_v49 }
  0xc5   : > { %v892_v16 = vpop.f32.mrf.mxu0 }
  0xc6   : > { %v2632_v17 = vadd.f32 %v892_v16, %v822_v11 }
  0xc7   : > { %v797_v18 = vpop.f32.mrf.mxu3 }
  0xc8   : > { %2222 = vmatmul.msk.f32.gmra.mxu0 %vm428_vm0, %v2553_v46  ;;  %v823_v19 = vadd.f32 %v797_v18, %v724_v14  ;;  %v613_v20 = vpop.f32.mrf.mxu1 }
  0xc9   : > { %v614_v22 = vadd.f32 %v613_v20, %v536_v50 }
  0xcb   : > { %v725_v24 = vadd.f32 %v701_v15, %v614_v22  ;;  %2194 = vmatmul.msk.f32.gmra.mxu1 %vm428_vm0, %v938_v21 }
  0xcc   : > { %v704_v25 = vpop.f32.mrf.mxu2  ;;  %2214 = vmatmul.msk.f32.gmra.mxu3 %vm428_vm0, %v1134_v23 }
  0xcd   : > { %v895_v26 = vpop.f32.mrf.mxu0 }
  0xce   : > { %v2638_v27 = vadd.f32 %v895_v26, %v823_v19 }
  0xcf   : > { %v800_v28 = vpop.f32.mrf.mxu3 }
  0xd0   : > { %2223 = vmatmul.msk.f32.gmra.mxu0 %vm428_vm0, %v938_v21  ;;  %v824_v29 = vadd.f32 %v800_v28, %v725_v24  ;;  %v616_v30 = vpop.f32.mrf.mxu1 }
  0xd1   : > { %v617_v31 = vadd.f32 %v616_v30, %v2590_v52 }
  0xd3   : > { %v726_v32 = vadd.f32 %v704_v25, %v617_v31 }
  0xd4   : > { %v707_v33 = vpop.f32.mrf.mxu2 }
  0xd5   : > { %v898_v34 = vpop.f32.mrf.mxu0 }
  0xd6   : > { %v2642_v36 = vadd.f32 %v898_v34, %v824_v29  ;;  %v2667_v29 = vld [vmem:[%s3177_s4] ss:$0 sm:$0xff] }
  0xd7   : > { %v803_v37 = vpop.f32.mrf.mxu3 }
  0xd8   : > { %2224 = vmatmul.msk.f32.gmra.mxu0 %vm428_vm0, %v1232_v35  ;;  %v825_v38 = vadd.f32 %v803_v37, %v726_v32  ;;  %v619_v39 = vpop.f32.mrf.mxu1 }
  0xd9   : > { %v620_v40 = vadd.f32 %v619_v39, %v2601_v56 }
  0xdb   : > { %v727_v41 = vadd.f32 %v707_v33, %v620_v40 }
  0xdc   : > { %v710_v42 = vpop.f32.mrf.mxu2 }
  0xdd   : > { %v901_v43 = vpop.f32.mrf.mxu0 }
  0xde   : > { %v2646_v44 = vadd.f32 %v901_v43, %v825_v38 }
  0xdf   : > { %v806_v45 = vpop.f32.mrf.mxu3 }
  0xe0   : > { %v826_v46 = vadd.f32 %v806_v45, %v727_v41  ;;  %v622_v47 = vpop.f32.mrf.mxu1 }
  0xe1   : > { %v623_v48 = vadd.f32 %v622_v47, %v2593_v54 }
  0xe3   : > { %v728_v49 = vadd.f32 %v710_v42, %v623_v48 }
  0xe4   : > { %v713_v50 = vpop.f32.mrf.mxu2 }
  0xe5   : > { %v904_v52 = vpop.f32.mrf.mxu0 }
  0xe6   : > { %v2649_v53 = vadd.f32 %v904_v52, %v826_v46 }
  0xe7   : > { %v809_v57 = vpop.f32.mrf.mxu3 }
  0xe8   : > { %v827_v58 = vadd.f32 %v809_v57, %v728_v49  ;;  %v625_v60 = vpop.f32.mrf.mxu1 }
  0xe9   : > { %v626_v56 = vadd.f32 %v625_v60, %v2587_v51 }
  0xeb   : > { %v729_v61 = vadd.f32 %v713_v50, %v626_v56 }
  0xec   : > { %v716_v62 = vpop.f32.mrf.mxu2 }
  0xed   : > { %v907_v63 = vpop.f32.mrf.mxu0 }
  0xee   : > { %v2652_v0 = vadd.f32 %v907_v63, %v827_v58 }
  0xef   : > { %v812_v1 = vpop.f32.mrf.mxu3 }
  0xf0   : > { %v828_v2 = vadd.f32 %v812_v1, %v729_v61  ;;  %v628_v3 = vpop.f32.mrf.mxu1 }
  0xf1   : > { %v629_v54 = vadd.f32 %v628_v3, %v2598_v55 }
  0xf3   : > { %v730_v4 = vadd.f32 %v716_v62, %v629_v54 }
  0xf4   : > { %v719_v5 = vpop.f32.mrf.mxu2 }
  0xf5   : > { %v910_v6 = vpop.f32.mrf.mxu0 }
  0xf6   : > { %v2655_v7 = vadd.f32 %v910_v6, %v828_v2 }
  0xf7   : > { %v815_v8 = vpop.f32.mrf.mxu3 }
  0xf8   : > { %v829_v10 = vadd.f32 %v815_v8, %v730_v4  ;;  %v631_v11 = vpop.f32.mrf.mxu1 }
  0xf9   : > { %v632_v51 = vadd.f32 %v631_v11, %v2608_v59 }
  0xfb   : > { %v731_v12 = vadd.f32 %v719_v5, %v632_v51 }
  0xfc   : > { %v1085_v13 = vpop.f32.mrf.mxu2 }
  0xfd   : > { %v913_v14 = vpop.f32.mrf.mxu0 }
  0xfe   : > { %v2658_v15 = vadd.f32 %v913_v14, %v829_v10 }
  0xff   : > { %v818_v16 = vpop.f32.mrf.mxu3 }
 0x100   : > { %v830_v18 = vadd.f32 %v818_v16, %v731_v12  ;;  %v987_v19 = vpop.f32.mrf.mxu1 }
 0x101   : > { %v1017_v55 = vadd.f32 %v987_v19, %v2624_v9 }
 0x103   : > { %v1115_v24 = vadd.f32 %v1085_v13, %v1017_v55 }
 0x104   : > { %v1088_v20 = vpop.f32.mrf.mxu2 }
 0x105   : > { %v916_v21 = vpop.f32.mrf.mxu0 }
 0x106   : > { %v2661_v22 = vadd.f32 %v916_v21, %v830_v18 }
 0x107   : > { %v1183_v23 = vpop.f32.mrf.mxu3 }
 0x108   : > { %v990_v25 = vpop.f32.mrf.mxu1  ;;  %v1213_v26 = vadd.f32 %v1183_v23, %v1115_v24 }
 0x109   : > { %v1018_v59 = vadd.f32 %v990_v25, %v2632_v17 }
 0x10b   : > { %v1116_v33 = vadd.f32 %v1088_v20, %v1018_v59 }
 0x10c   : > { %v1091_v28 = vpop.f32.mrf.mxu2 }
 0x10d   : > { %v1281_v30 = vpop.f32.mrf.mxu0 }
 0x10e   : > { %v1311_v31 = vadd.f32 %v1281_v30, %v1213_v26 }
 0x10f   : > { %v1186_v32 = vpop.f32.mrf.mxu3 }
 0x110   : > { %v1325_v9 = vadd.f32 %v2667_v29, %v1311_v31  ;;  %v993_v34 = vpop.f32.mrf.mxu1  ;;  %v1214_v37 = vadd.f32 %v1186_v32, %v1116_v33 }
 0x111   : > { %v1019_v17 = vadd.f32 %v993_v34, %v2638_v27 }
 0x112   : > { %v1335_v35 = vmax.f32 %v1325_v9, 0.0 }
 0x113   : > { %v1117_v43 = vadd.f32 %v1091_v28, %v1019_v17 }
 0x114   : > { %v1094_v38 = vpop.f32.mrf.mxu2  ;;  %1346 = vst.msk [vmem:[#allocation3 + $0x1] sm:$0xff] %vm1345_vm2, %v1335_v35 }
 0x115   : > { %1357 = vst.msk [vmem:[#allocation3] sm:$0x1] %vm1356_vm3, %v1335_v35  ;;  %v1284_v39 = vpop.f32.mrf.mxu0 }
 0x116   : > { %1368 = vst.msk [vmem:[#allocation3 + $0x2] sm:$0x80] %vm1367_vm4, %v1335_v35  ;;  %v1312_v40 = vadd.f32 %v1284_v39, %v1214_v37 }
 0x117   : > { %v1189_v41 = vpop.f32.mrf.mxu3 }
 0x118   : > { %v1326_v42 = vadd.f32 %v2667_v29, %v1312_v40  ;;  %v996_v45 = vpop.f32.mrf.mxu1  ;;  %v1215_v47 = vadd.f32 %v1189_v41, %v1117_v43 }
 0x119   : > { %v1020_v49 = vadd.f32 %v996_v45, %v2642_v36 }
 0x11a   : > { %v1336_v46 = vmax.f32 %v1326_v42, 0.0 }
 0x11b   : > { %v1118_v58 = vadd.f32 %v1094_v38, %v1020_v49 }
 0x11c   : > { %v1097_v48 = vpop.f32.mrf.mxu2  ;;  %1347 = vst.msk [vmem:[#allocation3 + $0x11] sm:$0xff] %vm1345_vm2, %v1336_v46 }
 0x11d   : > { %1358 = vst.msk [vmem:[#allocation3 + $0x10] sm:$0x1] %vm1356_vm3, %v1336_v46  ;;  %v1287_v27 = vpop.f32.mrf.mxu0 }
 0x11e   : > { %1369 = vst.msk [vmem:[#allocation3 + $0x12] sm:$0x80] %vm1367_vm4, %v1336_v46  ;;  %v1313_v50 = vadd.f32 %v1287_v27, %v1215_v47 }
 0x11f   : > { %v1192_v52 = vpop.f32.mrf.mxu3 }
 0x120   : > { %v1327_v57 = vadd.f32 %v2667_v29, %v1313_v50  ;;  %v999_v60 = vpop.f32.mrf.mxu1  ;;  %v1216_v61 = vadd.f32 %v1192_v52, %v1118_v58 }
 0x121   : > { %v1021_v63 = vadd.f32 %v999_v60, %v2646_v44 }
 0x122   : > { %v1337_v56 = vmax.f32 %v1327_v57, 0.0 }
 0x123   : > { %v1119_v5 = vadd.f32 %v1097_v48, %v1021_v63 }
 0x124   : > { %v1383_v62 = vld [vmem:[#allocation3 + $0x10] sm:$0xff]  ;;  %1348 = vst.msk [vmem:[#allocation3 + $0x21] sm:$0xff] %vm1345_vm2, %v1337_v56  ;;  %v1100_v1 = vpop.f32.mrf.mxu2 }
 0x125   : > { %v1384_v36 = vld [vmem:[#allocation3 + $0x18] sm:$0x3]  ;;  %1385 = vst.msk [vmem:[#allocation3] sm:$0xff] %vm1345_vm2, %v1383_v62  ;;  %v1290_v2 = vpop.f32.mrf.mxu0  ;;  %v1411_v51 = vmul.f32 0.75, %v1383_v62  ;;  %v1445_v20 = vmul.f32 0.25, %v1383_v62 }
 0x126   : > { %1359 = vst.msk [vmem:[#allocation3 + $0x20] sm:$0x1] %vm1356_vm3, %v1337_v56  ;;  %v1314_v3 = vadd.f32 %v1290_v2, %v1216_v61  ;;  %v1396_v11 = vld [vmem:[#allocation3 + $0x18] sm:$0x3] }
 0x127   : > { %1370 = vst.msk [vmem:[#allocation3 + $0x22] sm:$0x80] %vm1367_vm4, %v1337_v56  ;;  %v1195_v54 = vpop.f32.mrf.mxu3  ;;  %v1430_v13 = vld [vmem:[#allocation3 + $0x18] sm:$0x3]  ;;  %v1412_v16 = vmul.f32 0.75, %v1396_v11 }
 0x128   : > { %v1328_v4 = vadd.f32 %v2667_v29, %v1314_v3  ;;  %v1002_v6 = vpop.f32.mrf.mxu1  ;;  %1387 = vst.msk [vmem:[#allocation3 + $0x8] sm:$0x3] %vm1386_vm5, %v1384_v36  ;;  %v1217_v44 = vadd.f32 %v1195_v54, %v1119_v5  ;;  %v1446_v32 = vmul.f32 0.25, %v1430_v13 }
 0x129   : > { %v1022_v10 = vadd.f32 %v1002_v6, %v2649_v53 }
 0x12a   : > { %v1338_v8 = vmax.f32 %v1328_v4, 0.0 }
 0x12b   : > { %v1120_v21 = vadd.f32 %v1100_v1, %v1022_v10 }
 0x12c   : > { %1349 = vst.msk [vmem:[#allocation3 + $0x31] sm:$0xff] %vm1345_vm2, %v1338_v8  ;;  %v1427_v12 = vld [vmem:[#allocation3] sm:$0xff]  ;;  %v1103_v25 = vpop.f32.mrf.mxu2 }
 0x12d   : > { %1360 = vst.msk [vmem:[#allocation3 + $0x30] sm:$0x1] %vm1356_vm3, %v1338_v8  ;;  %v1293_v14 = vpop.f32.mrf.mxu0  ;;  %v1443_v18 = vmul.f32 0.25, %v1427_v12  ;;  %v1476_v19 = vld [vmem:[#allocation3 + $0x20] sm:$0xff] }
 0x12e   : > { %1371 = vst.msk [vmem:[#allocation3 + $0x32] sm:$0x80] %vm1367_vm4, %v1338_v8  ;;  %v1315_v55 = vadd.f32 %v1293_v14, %v1217_v44  ;;  %v1477_v23 = vld [vmem:[#allocation3 + $0x28] sm:$0x3]  ;;  %v2691_v24 = vmul.f32 0.25, %v1476_v19  ;;  %v2693_v53 = vmul.f32 0.75, %v1476_v19 }
 0x12f   : > { %v1198_v26 = vpop.f32.mrf.mxu3  ;;  %v1428_v28 = vld [vmem:[#allocation3 + $0x8] sm:$0x3]  ;;  %v2695_v59 = vadd.f32 %v1443_v18, %v1411_v51  ;;  %v1493_v30 = vmul.f32 0.25, %v1477_v23 }
 0x130   : > { %v1398_v31 = vld [vmem:[#allocation3 + $0x28] sm:$0x3]  ;;  %v1329_v9 = vadd.f32 %v2667_v29, %v1315_v55  ;;  %v1218_v33 = vadd.f32 %v1198_v26, %v1120_v21  ;;  %v1005_v34 = vpop.f32.mrf.mxu1  ;;  %v1444_v35 = vmul.f32 0.25, %v1428_v28  ;;  %v2699_v37 = vadd.f32 %v2691_v24, %v1411_v51 }
 0x131   : > { %v1023_v38 = vadd.f32 %v1005_v34, %v2652_v0  ;;  %v2703_v17 = vmul.f32 0.25, %v2695_v59  ;;  %v1509_v39 = vadd.f32 %v1493_v30, %v1412_v16  ;;  %v2705_v40 = vmul.f32 0.75, %v1398_v31  ;;  %v1432_v11 = vld [vmem:[#allocation3 + $0x28] sm:$0x3] }
 0x132   : > { %v1339_v41 = vmax.f32 %v1329_v9, 0.0  ;;  %v1460_v42 = vadd.f32 %v1444_v35, %v1412_v16  ;;  %v2709_v43 = vmul.f32 0.25, %v2699_v37  ;;  %v2712_v45 = vadd.f32 %v1445_v20, %v2693_v53 }
 0x133   : > { %v1556_v46 = vrot.slane %v2703_v17, 7  ;;  %v1761_v47 = vmul.f32 0.75, %v1509_v39  ;;  %v2715_v48 = vmul.f32 0.25, %v1509_v39  ;;  %v1462_v0 = vadd.f32 %v1446_v32, %v2705_v40 }
 0x134   : > { %1350 = vst.msk [vmem:[#allocation3 + $0x41] sm:$0xff] %vm1345_vm2, %v1339_v41  ;;  %v1525_v49 = vmul.f32 0.75, %v1460_v42  ;;  %v1605_v27 = vmul.f32 0.25, %v1460_v42  ;;  %v1792_v50 = vrot.slane %v2709_v43, 7  ;;  %v2721_v52 = vmul.f32 0.25, %v2712_v45  ;;  %v1399_v4 = vld [vmem:[#allocation3 + $0x30] sm:$0xff]  ;;  %v1106_v51 = vpop.f32.mrf.mxu2 }
 0x135   : > { %1361 = vst.msk [vmem:[#allocation3 + $0x40] sm:$0x1] %vm1356_vm3, %v1339_v41  ;;  %v1296_v57 = vpop.f32.mrf.mxu0  ;;  %v1858_v58 = vrot.slane %v2715_v48, 1  ;;  %v1479_v63 = vld [vmem:[#allocation3 + $0x38] sm:$0x3]  ;;  %v1527_v36 = vmul.f32 0.75, %v1462_v0  ;;  %v1121_v8 = vadd.f32 %v1103_v25, %v1023_v38 }
 0x136   : > { %1372 = vst.msk [vmem:[#allocation3 + $0x42] sm:$0x80] %vm1367_vm4, %v1339_v41  ;;  %v1316_v60 = vadd.f32 %v1296_v57, %v1218_v33  ;;  %v1623_v56 = vrot.slane %v1605_v27, 1  ;;  %v1573_v61 = vadd.f32 %v1556_v46, %v1525_v49  ;;  %v1809_v62 = vadd.f32 %v1792_v50, %v1761_v47  ;;  %v1400_v10 = vld [vmem:[#allocation3 + $0x38] sm:$0x3] }
 0x137   : > { %v1898_v1 = vadd.f32 %v1858_v58, %v1761_v47  ;;  %v1606_v2 = vmul.f32 0.25, %v1462_v0  ;;  %v1557_v3 = vrot.slane %v2721_v52, 7  ;;  %v1201_v54 = vpop.f32.mrf.mxu3  ;;  %v1495_v12 = vmul.f32 0.25, %v1479_v63 }
 0x138   : > { %v1330_v5 = vadd.f32 %v2667_v29, %v1316_v60  ;;  %v1663_v6 = vadd.f32 %v1623_v56, %v1525_v49  ;;  %1590 = vst.msk [vmem:[%s2726_s23 + $0x7] sm:$0x1] %vm1356_vm3, %v1573_v61  ;;  %v1008_v44 = vpop.f32.mrf.mxu1  ;;  %v1219_v18 = vadd.f32 %v1201_v54, %v1121_v8  ;;  %v1622_v19 = vrot.slane %v2703_v17, 1 }
 0x139   : > { %1931 = vrot.lane.b32.xlu2 %v1898_v1, %s2319_s24  ;;  %2226 = vst.msk [vmem:[%s2726_s23 + $0xf] sm:$0x1] %vm1356_vm3, %v1809_v62  ;;  %v1626_v13 = vrot.slane %v1606_v2, 1  ;;  %v1575_v14 = vadd.f32 %v1557_v3, %v1527_v36  ;;  %v2748_v20 = vmul.f32 0.75, %v1399_v4  ;;  %v2752_v21 = vmul.f32 0.75, %v1400_v10 }
 0x13a   : > { %v1340_v16 = vmax.f32 %v1330_v5, 0.0  ;;  %1696 = vrot.lane.b32.xlu0 %v1663_v6, %s2319_s24  ;;  %v1448_v23 = vmul.f32 0.25, %v1432_v11  ;;  %v1024_v25 = vadd.f32 %v1008_v44, %v2655_v7  ;;  %v1625_v28 = vrot.slane %v2721_v52, 1 }
 0x13b   : > { %v1665_v55 = vadd.f32 %v1626_v13, %v1527_v36  ;;  %1592 = vst.msk [vmem:[%s2726_s23 + $0x17] sm:$0x1] %vm1356_vm3, %v1575_v14  ;;  %v1463_v26 = vadd.f32 %v2691_v24, %v2748_v20  ;;  %v1624_v31 = vsel %vm1621_vm6, %v1622_v19, %v1623_v56  ;;  %v2763_v9 = vmul.f32 0.25, %v1399_v4 }
 0x13c   : > { %1351 = vst.msk [vmem:[#allocation3 + $0x51] sm:$0xff] %vm1345_vm2, %v1340_v16  ;;  %v1464_v32 = vadd.f32 %v1448_v23, %v2752_v21  ;;  %v2767_v7 = vadd.f32 %v1495_v12, %v2705_v40  ;;  %v2770_v24 = vmul.f32 0.75, %v2695_v59  ;;  %v2775_v38 = vmul.f32 0.75, %v2712_v45  ;;  %v1109_v63 = vpop.f32.mrf.mxu2  ;;  %v1480_v1 = vld [vmem:[#allocation3 + $0x40] sm:$0xff] }
 0x13d   : > { %1362 = vst.msk [vmem:[#allocation3 + $0x50] sm:$0x1] %vm1356_vm3, %v1340_v16  ;;  %1700 = vrot.lane.b32.xlu1 %v1665_v55, %s2319_s24  ;;  %v1299_v30 = vpop.f32.mrf.mxu0  ;;  %v2772_v34 = vmul.f32 0.25, %v1463_v26  ;;  %v1627_v39 = vsel %vm1621_vm6, %v1625_v28, %v1626_v13  ;;  %v1510_v42 = vadd.f32 %v2763_v9, %v2693_v53  ;;  %v1122_v59 = vadd.f32 %v1106_v51, %v1024_v25  ;;  %v1481_v36 = vld [vmem:[#allocation3 + $0x48] sm:$0x3] }
 0x13e   : > { %1373 = vst.msk [vmem:[#allocation3 + $0x52] sm:$0x80] %vm1367_vm4, %v1340_v16  ;;  %v1317_v33 = vadd.f32 %v1299_v30, %v1219_v18  ;;  %v1607_v35 = vmul.f32 0.25, %v1464_v32  ;;  %v1662_v40 = vadd.f32 %v1624_v31, %v2770_v24  ;;  %v1529_v27 = vmul.f32 0.75, %v1464_v32  ;;  %v1402_v31 = vld [vmem:[#allocation3 + $0x48] sm:$0x3] }
 0x13f   : > { %v1204_v41 = vpop.f32.mrf.mxu3  ;;  %v1558_v0 = vrot.slane %v2772_v34, 7  ;;  %v1628_v60 = vrot.slane %v2772_v34, 1  ;;  %v2784_v45 = vmul.f32 0.25, %v1510_v42  ;;  %v1664_v61 = vadd.f32 %v1627_v39, %v2775_v38 }
 0x140   : > { %v1331_v47 = vadd.f32 %v2667_v29, %v1317_v33  ;;  %v1011_v49 = vpop.f32.mrf.mxu1  ;;  %v1629_v57 = vrot.slane %v1607_v35, 1  ;;  %v1220_v53 = vadd.f32 %v1204_v41, %v1122_v59  ;;  %v2789_v62 = vmul.f32 0.25, %v2767_v7 }
 0x141   : > { %v1577_v54 = vadd.f32 %v1558_v0, %v1529_v27  ;;  %v1025_v4 = vadd.f32 %v1011_v49, %v2658_v15  ;;  %v1860_v5 = vrot.slane %v2784_v45, 1  ;;  %v1857_v8 = vrot.slane %v2709_v43, 1 }
 0x142   : > { %v1341_v56 = vmax.f32 %v1331_v47, 0.0  ;;  %1694 = vrot.lane.b32.xlu0 %v1662_v40, %s2319_s24  ;;  %v1667_v2 = vadd.f32 %v1629_v57, %v1529_v27  ;;  %v1861_v6 = vrot.slane %v2789_v62, 1  ;;  %v2801_v10 = vmul.f32 0.75, %v1463_v26  ;;  %v1434_v40 = vld [vmem:[#allocation3 + $0x38] sm:$0x3] }
 0x143   : > { %v1630_v15 = vsel %vm1621_vm6, %v1628_v60, %v1629_v57  ;;  %v2804_v11 = vmul.f32 0.25, %v1480_v1  ;;  %v1497_v51 = vmul.f32 0.25, %v1481_v36  ;;  %v2807_v13 = vmul.f32 0.75, %v1510_v42  ;;  %1594 = vst.msk [vmem:[%s2726_s23 + $0x27] sm:$0x1] %vm1356_vm3, %v1577_v54 }
 0x144   : > { %1352 = vst.msk [vmem:[#allocation3 + $0x61] sm:$0xff] %vm1345_vm2, %v1341_v56  ;;  %1704 = vrot.lane.b32.xlu2 %v1667_v2, %s2319_s24  ;;  %v1862_v14 = vsel %vm1621_vm6, %v1860_v5, %v1861_v6  ;;  %v1859_v16 = vsel %vm1621_vm6, %v1857_v8, %v1858_v58  ;;  %v2816_v18 = vmul.f32 0.75, %v2699_v37  ;;  %v1123_v19 = vadd.f32 %v1109_v63, %v1025_v4  ;;  %v1482_v39 = vld [vmem:[#allocation3 + $0x50] sm:$0xff] }
 0x145   : > { %1363 = vst.msk [vmem:[#allocation3 + $0x60] sm:$0x1] %vm1356_vm3, %v1341_v56  ;;  %1698 = vrot.lane.b32.xlu1 %v1664_v61, %s2319_s24  ;;  %v1302_v44 = vpop.f32.mrf.mxu0  ;;  %v1512_v23 = vadd.f32 %v2804_v11, %v2748_v20  ;;  %v1513_v25 = vadd.f32 %v1497_v51, %v2752_v21  ;;  %v1666_v28 = vadd.f32 %v1630_v15, %v2801_v10  ;;  %v1793_v48 = vrot.slane %v2784_v45, 7  ;;  %v1483_v20 = vld [vmem:[#allocation3 + $0x58] sm:$0x3] }
 0x146   : > { %1374 = vst.msk [vmem:[#allocation3 + $0x62] sm:$0x80] %vm1367_vm4, %v1341_v56  ;;  %v1318_v12 = vadd.f32 %v1302_v44, %v1220_v53  ;;  %v1899_v58 = vadd.f32 %v1862_v14, %v2807_v13  ;;  %v1897_v37 = vadd.f32 %v1859_v16, %v2816_v18  ;;  %v1763_v42 = vmul.f32 0.75, %v2767_v7  ;;  %v1112_v56 = vpop.f32.mrf.mxu2  ;;  %v1404_v5 = vld [vmem:[#allocation3 + $0x58] sm:$0x3] }
 0x147   : > { %v1207_v55 = vpop.f32.mrf.mxu3  ;;  %v2826_v33 = vmul.f32 0.25, %v1512_v23  ;;  %v1843_v35 = vmul.f32 0.25, %v1513_v25  ;;  %v1417_v47 = vmul.f32 0.75, %v1480_v1  ;;  %v1765_v57 = vmul.f32 0.75, %v1513_v25 }
 0x148   : > { %v1332_v26 = vadd.f32 %v2667_v29, %v1318_v12  ;;  %v1014_v30 = vpop.f32.mrf.mxu1  ;;  %v1221_v32 = vadd.f32 %v1207_v55, %v1123_v19  ;;  %v1811_v60 = vadd.f32 %v1793_v48, %v1763_v42  ;;  %v1418_v61 = vmul.f32 0.75, %v1402_v31 }
 0x149   : > { %v1026_v21 = vadd.f32 %v1014_v30, %v2661_v22  ;;  %v1794_v59 = vrot.slane %v2826_v33, 7  ;;  %v1863_v49 = vrot.slane %v2826_v33, 1  ;;  %v1864_v27 = vrot.slane %v1843_v35, 1 }
 0x14a   : > { %v1342_v41 = vmax.f32 %v1332_v26, 0.0  ;;  %1933 = vrot.lane.b32.xlu0 %v1899_v58, %s2319_s24  ;;  %v2836_v53 = vmul.f32 0.25, %v1482_v39  ;;  %v1499_v22 = vmul.f32 0.25, %v1483_v20  ;;  %v2841_v62 = vmul.f32 0.75, %v1512_v23  ;;  %2228 = vst.msk [vmem:[%s2726_s23 + $0x1f] sm:$0x1] %vm1356_vm3, %v1811_v60 }
 0x14b   : > { %v1813_v63 = vadd.f32 %v1794_v59, %v1765_v57  ;;  %v1450_v1 = vmul.f32 0.25, %v1434_v40  ;;  %v1865_v2 = vsel %vm1621_vm6, %v1863_v49, %v1864_v27  ;;  %v1900_v54 = vadd.f32 %v1861_v6, %v1763_v42 }
 0x14c   : > { %1353 = vst.msk [vmem:[#allocation3 + $0x71] sm:$0xff] %vm1345_vm2, %v1342_v41  ;;  %1702 = vrot.lane.b32.xlu2 %v1666_v28, %s2319_s24  ;;  %v1514_v4 = vadd.f32 %v2836_v53, %v1417_v47  ;;  %v1124_v8 = vadd.f32 %v1112_v56, %v1026_v21  ;;  %v1515_v15 = vadd.f32 %v1499_v22, %v1418_v61  ;;  %v2856_v55 = vmul.f32 0.75, %v1482_v39  ;;  %v1436_v28 = vld [vmem:[#allocation3 + $0x48] sm:$0x3]  ;;  %v1405_v60 = vld [vmem:[#allocation3 + $0x60] sm:$0xff] }
 0x14d   : > { %1364 = vst.msk [vmem:[#allocation3 + $0x70] sm:$0x1] %vm1356_vm3, %v1342_v41  ;;  %1929 = vrot.lane.b32.xlu1 %v1897_v37, %s2319_s24  ;;  %v1305_v7 = vpop.f32.mrf.mxu0  ;;  %v1465_v51 = vadd.f32 %v2763_v9, %v1417_v47  ;;  %v1466_v12 = vadd.f32 %v1450_v1, %v1418_v61  ;;  %v1902_v16 = vadd.f32 %v1864_v27, %v1765_v57  ;;  %v2861_v26 = vmul.f32 0.75, %v1404_v5  ;;  %v1406_v56 = vld [vmem:[#allocation3 + $0x68] sm:$0x3] }
 0x14e   : > { %1375 = vst.msk [vmem:[#allocation3 + $0x72] sm:$0x80] %vm1367_vm4, %v1342_v41  ;;  %v1319_v36 = vadd.f32 %v1305_v7, %v1221_v32  ;;  %v2854_v19 = vmul.f32 0.25, %v1514_v4  ;;  %v1901_v6 = vadd.f32 %v1865_v2, %v2841_v62  ;;  %v1767_v9 = vmul.f32 0.75, %v1515_v15  ;;  %v1438_v7 = vld [vmem:[#allocation3 + $0x58] sm:$0x3] }
 0x14f   : > { %2230 = vst.msk [vmem:[%s2726_s23 + $0x2f] sm:$0x1] %vm1356_vm3, %v1813_v63  ;;  %v1210_v44 = vpop.f32.mrf.mxu3  ;;  %v2859_v25 = vmul.f32 0.25, %v1465_v51  ;;  %v1608_v31 = vmul.f32 0.25, %v1466_v12  ;;  %v1844_v37 = vmul.f32 0.25, %v1515_v15  ;;  %v1531_v39 = vmul.f32 0.75, %v1466_v12 }
 0x150   : > { %v1333_v14 = vadd.f32 %v2667_v29, %v1319_v36  ;;  %v1222_v23 = vadd.f32 %v1210_v44, %v1124_v8  ;;  %v3181_v30 = vrot.slane %v2854_v19, 7  ;;  %v1452_v21 = vmul.f32 0.25, %v1436_v28  ;;  %v1485_v12 = vld [vmem:[#allocation3 + $0x68] sm:$0x3] }
 0x151   : > { %v1559_v32 = vrot.slane %v2859_v25, 7  ;;  %v1631_v35 = vrot.slane %v2859_v25, 1  ;;  %v1632_v41 = vrot.slane %v1608_v31, 1  ;;  %v2872_v42 = vadd.f32 %v2804_v11, %v2856_v55 }
 0x152   : > { %v1343_v58 = vmax.f32 %v1333_v14, 0.0  ;;  %1939 = vrot.lane.b32.xlu0 %v1902_v16, %s2319_s24  ;;  %v1815_v20 = vadd.f32 %v3181_v30, %v1767_v9  ;;  %v2880_v27 = vmul.f32 0.75, %v1465_v51  ;;  %v1468_v11 = vadd.f32 %v1452_v21, %v2861_v26 }
 0x153   : > { %v1579_v40 = vadd.f32 %v1559_v32, %v1531_v39  ;;  %v1633_v57 = vsel %vm1621_vm6, %v1631_v35, %v1632_v41  ;;  %v1867_v61 = vrot.slane %v1844_v37, 1  ;;  %v2887_v22 = vmul.f32 0.25, %v2872_v42 }
 0x154   : > { %1354 = vst.msk [vmem:[#allocation3 + $0x81] sm:$0xff] %vm1345_vm2, %v1343_v58  ;;  %1937 = vrot.lane.b32.xlu2 %v1901_v6, %s2319_s24  ;;  %v1668_v1 = vadd.f32 %v1633_v57, %v2880_v27  ;;  %v1609_v36 = vmul.f32 0.25, %v1468_v11  ;;  %v1422_v5 = vmul.f32 0.75, %v1406_v56  ;;  %v2895_v44 = vmul.f32 0.75, %v1514_v4 }
 0x155   : > { %1365 = vst.msk [vmem:[#allocation3 + $0x80] sm:$0x1] %vm1356_vm3, %v1343_v58  ;;  %1935 = vrot.lane.b32.xlu1 %v1900_v54, %s2319_s24  ;;  %v1308_v47 = vpop.f32.mrf.mxu0  ;;  %v1560_v2 = vrot.slane %v2887_v22, 7  ;;  %v1421_v54 = vmul.f32 0.75, %v1405_v60  ;;  %v1866_v15 = vrot.slane %v2854_v19, 1  ;;  %v1454_v51 = vmul.f32 0.25, %v1438_v7 }
 0x156   : > { %1376 = vst.msk [vmem:[#allocation3 + $0x82] sm:$0x80] %vm1367_vm4, %v1343_v58  ;;  %v1320_v49 = vadd.f32 %v1308_v47, %v1222_v23  ;;  %v1904_v14 = vadd.f32 %v1867_v61, %v1767_v9  ;;  %v1533_v16 = vmul.f32 0.75, %v1468_v11  ;;  %v2901_v23 = vld [vmem:[#allocation3 + $0x70] sm:$0xff]  ;;  %v1487_v28 = vld [vmem:[#allocation3 + $0x78] sm:$0x3]  ;;  %v1572_v30 = vadd.f32 %v1556_v46, %v2770_v24 }
 0x157   : > { %2232 = vst.msk [vmem:[%s2726_s23 + $0x3f] sm:$0x1] %vm1356_vm3, %v1815_v20  ;;  %v2899_v6 = vadd.f32 %v2836_v53, %v1421_v54  ;;  %v1634_v4 = vrot.slane %v2887_v22, 1  ;;  %v1635_v31 = vrot.slane %v1609_v36, 1  ;;  %v1470_v37 = vadd.f32 %v1454_v51, %v1422_v5 }
 0x158   : > { %v1334_v63 = vadd.f32 %v2667_v29, %v1320_v49  ;;  %1596 = vst.msk [vmem:[%s2726_s23 + $0x37] sm:$0x1] %vm1356_vm3, %v1579_v40  ;;  %v1669_v29 = vadd.f32 %v1632_v41, %v1531_v39  ;;  %v2907_v35 = vmul.f32 0.25, %v1405_v60  ;;  %v1581_v53 = vadd.f32 %v1560_v2, %v1533_v16 }
 0x159   : > { %v2915_v39 = vmul.f32 0.25, %v2899_v6  ;;  %v1501_v20 = vmul.f32 0.25, %v1485_v12  ;;  %v1868_v41 = vsel %vm1621_vm6, %v1866_v15, %v1867_v61  ;;  %v1535_v21 = vmul.f32 0.75, %v1470_v37  ;;  %1589 = vst.msk [vmem:[%s2726_s23 - $0x1] sm:$0xfe] %vm1588_vm7, %v1572_v30 }
 0x15a   : > { %v1344_v8 = vmax.f32 %v1334_v63, 0.0  ;;  %1706 = vrot.lane.b32.xlu0 %v1668_v1, %s2319_s24  ;;  %v1516_v47 = vadd.f32 %v2907_v35, %v2856_v55  ;;  %v1502_v40 = vmul.f32 0.25, %v2901_v23  ;;  %v2925_v57 = vmul.f32 0.25, %v1470_v37  ;;  %1598 = vst.msk [vmem:[%s2726_s23 + $0x47] sm:$0x1] %vm1356_vm3, %v1581_v53 }
 0x15b   : > { %v1561_v49 = vrot.slane %v2915_v39, 7  ;;  %v1517_v11 = vadd.f32 %v1501_v20, %v2861_v26  ;;  %v1503_v60 = vmul.f32 0.25, %v1487_v28  ;;  %v1636_v56 = vsel %vm1621_vm6, %v1634_v4, %v1635_v31  ;;  %v1440_v28 = vld [vmem:[#allocation3 + $0x68] sm:$0x3]  ;;  %v1408_v53 = vld [vmem:[#allocation3 + $0x78] sm:$0x3] }
 0x15c   : > { %1355 = vst.msk [vmem:[#allocation3 + $0x91] sm:$0xff] %vm1345_vm2, %v1344_v8  ;;  %v2904_v58 = vld [vmem:[#allocation3 + $0x80] sm:$0xff]  ;;  %1943 = vrot.lane.b32.xlu2 %v1904_v14, %s2319_s24  ;;  %v1671_v61 = vadd.f32 %v1635_v31, %v1533_v16  ;;  %v2930_v7 = vmul.f32 0.25, %v1516_v47  ;;  %v1518_v55 = vadd.f32 %v1502_v40, %v1421_v54  ;;  %v2933_v63 = vmul.f32 0.75, %v2872_v42 }
 0x15d   : > { %1366 = vst.msk [vmem:[#allocation3 + $0x90] sm:$0x1] %vm1356_vm3, %v1344_v8  ;;  %v1390_v9 = vld [vmem:[#allocation3 + $0x88] sm:$0x3]  ;;  %1708 = vrot.lane.b32.xlu1 %v1669_v29, %s2319_s24  ;;  %v1583_v1 = vadd.f32 %v1561_v49, %v1535_v21  ;;  %v1845_v36 = vmul.f32 0.25, %v1517_v11  ;;  %v1519_v26 = vadd.f32 %v1503_v60, %v1422_v5  ;;  %v1769_v12 = vmul.f32 0.75, %v1517_v11 }
 0x15e   : > { %1377 = vst.msk [vmem:[#allocation3 + $0x92] sm:$0x80] %vm1367_vm4, %v1344_v8  ;;  %v1903_v8 = vadd.f32 %v1868_v41, %v2895_v44  ;;  %v3180_v15 = vrot.slane %v2930_v7, 7  ;;  %v1869_v51 = vrot.slane %v2930_v7, 1  ;;  %v1670_v54 = vadd.f32 %v1636_v56, %v2933_v63  ;;  %v1410_v16 = vld [vmem:[#allocation3 + $0x88] sm:$0x3] }
 0x15f   : > { %1392 = vst.msk [vmem:[#allocation3 + $0x90] sm:$0xff] %vm1345_vm2, %v2904_v58  ;;  %v1638_v42 = vrot.slane %v2925_v57, 1  ;;  %v1870_v14 = vrot.slane %v1845_v36, 1  ;;  %v2947_v29 = vmul.f32 0.25, %v1518_v55  ;;  %v1771_v37 = vmul.f32 0.75, %v1519_v26 }
 0x160   : > { %1393 = vst.msk [vmem:[#allocation3 + $0x98] sm:$0x3] %vm1386_vm5, %v1390_v9  ;;  %v1817_v5 = vadd.f32 %v3180_v15, %v1769_v12  ;;  %v1442_v9 = vld [vmem:[#allocation3 + $0x78] sm:$0x3]  ;;  %v2955_v20 = vmul.f32 0.75, %v1516_v47  ;;  %v1846_v41 = vmul.f32 0.25, %v1519_v26  ;;  %v1574_v46 = vadd.f32 %v1557_v3, %v2775_v38 }
 0x161   : > { %1600 = vst.msk [vmem:[%s2726_s23 + $0x57] sm:$0x1] %vm1356_vm3, %v1583_v1  ;;  %v1871_v4 = vsel %vm1621_vm6, %v1869_v51, %v1870_v14  ;;  %v3179_v31 = vrot.slane %v2947_v29, 7  ;;  %v1425_v57 = vmul.f32 0.75, %v2904_v58  ;;  %v1673_v11 = vadd.f32 %v1638_v42, %v1535_v21  ;;  %v1489_v47 = vld [vmem:[#allocation3 + $0x88] sm:$0x3] }
 0x162   : > { %1712 = vrot.lane.b32.xlu0 %v1671_v61, %s2319_s24  ;;  %2234 = vst.msk [vmem:[%s2726_s23 + $0x4f] sm:$0x1] %vm1356_vm3, %v1817_v5  ;;  %v2962_v56 = vmul.f32 0.75, %v1410_v16  ;;  %v1905_v61 = vadd.f32 %v1871_v4, %v2955_v20  ;;  %v1637_v1 = vrot.slane %v2915_v39, 1  ;;  %v1458_v36 = vmul.f32 0.25, %v1442_v9 }
 0x163   : > { %v1819_v60 = vadd.f32 %v3179_v31, %v1771_v37  ;;  %v1906_v51 = vadd.f32 %v1870_v14, %v1769_v12  ;;  %v1423_v26 = vmul.f32 0.75, %v2901_v23  ;;  %v1456_v21 = vmul.f32 0.25, %v1440_v28  ;;  %1591 = vst.msk [vmem:[%s2726_s23 + $0xf] sm:$0xfe] %vm1588_vm7, %v1574_v46 }
 0x164   : > { %1710 = vrot.lane.b32.xlu2 %v1670_v54, %s2319_s24  ;;  %v1424_v54 = vmul.f32 0.75, %v1408_v53  ;;  %v1872_v5 = vrot.slane %v2947_v29, 1  ;;  %v1873_v16 = vrot.slane %v1846_v41, 1  ;;  %v1474_v4 = vadd.f32 %v1458_v36, %v2962_v56 }
 0x165   : > { %1941 = vrot.lane.b32.xlu1 %v1903_v8, %s2319_s24  ;;  %v2966_v8 = vadd.f32 %v1502_v40, %v1425_v57  ;;  %2236 = vst.msk [vmem:[%s2726_s23 + $0x5f] sm:$0x1] %vm1356_vm3, %v1819_v60  ;;  %v1504_v31 = vmul.f32 0.25, %v2904_v58  ;;  %v1471_v12 = vadd.f32 %v2907_v35, %v1423_v26  ;;  %v1505_v9 = vmul.f32 0.25, %v1489_v47 }
 0x166   : > { %v1472_v14 = vadd.f32 %v1456_v21, %v1424_v54  ;;  %v2983_v23 = vmul.f32 0.75, %v1518_v55  ;;  %v1534_v28 = vmul.f32 0.75, %v2899_v6  ;;  %v1490_v58 = vld [vmem:[#allocation3 + $0x90] sm:$0xff]  ;;  %v1639_v36 = vsel %vm1621_vm6, %v1637_v1, %v1638_v42 }
 0x167   : > { %v2976_v40 = vmul.f32 0.25, %v2966_v8  ;;  %v2979_v60 = vadd.f32 %v1504_v31, %v1423_v26  ;;  %v1546_v53 = vmul.f32 0.25, %v1471_v12  ;;  %v1521_v35 = vadd.f32 %v1505_v9, %v1424_v54  ;;  %v1491_v9 = vld [vmem:[#allocation3 + $0x98] sm:$0x3] }
 0x168   : > { %v1611_v41 = vmul.f32 0.25, %v1472_v14  ;;  %v1537_v55 = vmul.f32 0.75, %v1472_v14  ;;  %v1908_v26 = vadd.f32 %v1873_v16, %v1771_v37  ;;  %v1506_v15 = vmul.f32 0.25, %v1490_v58 }
 0x169   : > { %v2989_v47 = vmul.f32 0.25, %v2979_v60  ;;  %v1563_v31 = vrot.slane %v2976_v40, 7  ;;  %v2994_v21 = vmul.f32 0.75, %v1521_v35  ;;  %v1539_v54 = vmul.f32 0.75, %v1474_v4 }
 0x16a   : > { %1945 = vrot.lane.b32.xlu0 %v1905_v61, %s2319_s24  ;;  %v1874_v61 = vsel %vm1621_vm6, %v1872_v5, %v1873_v16  ;;  %v1640_v5 = vrot.slane %v1546_v53, 1  ;;  %v1641_v42 = vrot.slane %v1611_v41, 1  ;;  %v1576_v37 = vadd.f32 %v1558_v0, %v2801_v10 }
 0x16b   : > { %v1798_v6 = vrot.slane %v2989_v47, 7  ;;  %v1672_v16 = vadd.f32 %v1639_v36, %v1534_v28  ;;  %v1587_v17 = vadd.f32 %v1563_v31, %v1539_v54  ;;  %v1507_v24 = vmul.f32 0.25, %v1491_v9 }
 0x16c   : > { %1716 = vrot.lane.b32.xlu2 %v1673_v11, %s2319_s24  ;;  %v2992_v11 = vmul.f32 0.25, %v1474_v4  ;;  %v1643_v4 = vrot.slane %v2976_v40, 1  ;;  %v1522_v34 = vadd.f32 %v1506_v15, %v1425_v57  ;;  %v1578_v0 = vadd.f32 %v1559_v32, %v2880_v27  ;;  %1593 = vst.msk [vmem:[%s2726_s23 + $0x1f] sm:$0xfe] %vm1588_vm7, %v1576_v37 }
 0x16d   : > { %1947 = vrot.lane.b32.xlu1 %v1906_v51, %s2319_s24  ;;  %v1562_v51 = vrot.slane %v1546_v53, 7  ;;  %v1821_v14 = vadd.f32 %v1798_v6, %v2994_v21  ;;  %v1907_v53 = vadd.f32 %v1874_v61, %v2983_v23  ;;  %v1642_v10 = vsel %vm1621_vm6, %v1640_v5, %v1641_v42  ;;  %1604 = vst.msk [vmem:[%s2726_s23 + $0x77] sm:$0x1] %vm1356_vm3, %v1587_v17 }
 0x16e   : > { %v1644_v41 = vrot.slane %v2992_v11, 1  ;;  %v1580_v52 = vadd.f32 %v1560_v2, %v2933_v63  ;;  %v1536_v3 = vmul.f32 0.75, %v1471_v12  ;;  %v1523_v38 = vadd.f32 %v1507_v24, %v2962_v56  ;;  %1595 = vst.msk [vmem:[%s2726_s23 + $0x2f] sm:$0xfe] %vm1588_vm7, %v1578_v0 }
 0x16f   : > { %v1585_v1 = vadd.f32 %v1562_v51, %v1537_v55  ;;  %2238 = vst.msk [vmem:[%s2726_s23 + $0x6f] sm:$0x1] %vm1356_vm3, %v1821_v14  ;;  %v1783_v25 = vmul.f32 0.25, %v1522_v34  ;;  %v1582_v32 = vadd.f32 %v1561_v49, %v1534_v28  ;;  %v1538_v27 = vmul.f32 0.75, %v2966_v8 }
 0x170   : > { %v1645_v15 = vsel %vm1621_vm6, %v1643_v4, %v1644_v41  ;;  %v1674_v22 = vadd.f32 %v1642_v10, %v1536_v3  ;;  %v1847_v57 = vmul.f32 0.25, %v1521_v35  ;;  %v1775_v63 = vmul.f32 0.75, %v1523_v38  ;;  %1597 = vst.msk [vmem:[%s2726_s23 + $0x3f] sm:$0xfe] %vm1588_vm7, %v1580_v52 }
 0x171   : > { %1602 = vst.msk [vmem:[%s2726_s23 + $0x67] sm:$0x1] %vm1356_vm3, %v1585_v1  ;;  %v1799_v2 = vrot.slane %v1783_v25, 7  ;;  %v1584_v56 = vadd.f32 %v1562_v51, %v1536_v3  ;;  %v1586_v40 = vadd.f32 %v1563_v31, %v1538_v27  ;;  %v1808_v30 = vadd.f32 %v1792_v50, %v2816_v18 }
 0x172   : > { %1951 = vrot.lane.b32.xlu0 %v1908_v26, %s2319_s24  ;;  %v1676_v49 = vadd.f32 %v1645_v15, %v1538_v27  ;;  %v1675_v8 = vadd.f32 %v1641_v42, %v1537_v55  ;;  %1599 = vst.msk [vmem:[%s2726_s23 + $0x4f] sm:$0xfe] %vm1588_vm7, %v1582_v32  ;;  %v1810_v12 = vadd.f32 %v1793_v48, %v2807_v13  ;;  %v1876_v28 = vrot.slane %v1847_v57, 1 }
 0x173   : > { %v1823_v39 = vadd.f32 %v1799_v2, %v1775_v63  ;;  %v1875_v58 = vrot.slane %v2989_v47, 1  ;;  %v1812_v43 = vadd.f32 %v1794_v59, %v2841_v62  ;;  %v1848_v50 = vmul.f32 0.25, %v1523_v38  ;;  %1601 = vst.msk [vmem:[%s2726_s23 + $0x5f] sm:$0xfe] %vm1588_vm7, %v1584_v56 }
 0x174   : > { %1949 = vrot.lane.b32.xlu2 %v1907_v53, %s2319_s24  ;;  %v3182_v45 = vrot.slane %v2854_v19, 7  ;;  %1603 = vst.msk [vmem:[%s2726_s23 + $0x6f] sm:$0xfe] %vm1588_vm7, %v1586_v40  ;;  %v3183_v18 = vrot.slane %v2930_v7, 7  ;;  %v1772_v33 = vmul.f32 0.75, %v2979_v60  ;;  %v3184_v59 = vrot.slane %v2947_v29, 7 }
 0x175   : > { %1714 = vrot.lane.b32.xlu1 %v1672_v16, %s2319_s24  ;;  %2240 = vst.msk [vmem:[%s2726_s23 + $0x7f] sm:$0x1] %vm1356_vm3, %v1823_v39  ;;  %v1677_v61 = vadd.f32 %v1644_v41, %v1539_v54  ;;  %v1877_v19 = vsel %vm1621_vm6, %v1875_v58, %v1876_v28  ;;  %v1879_v60 = vrot.slane %v1848_v50, 1 }
 0x176   : > { %v1814_v13 = vadd.f32 %v3182_v45, %v2895_v44  ;;  %v1816_v48 = vadd.f32 %v3183_v18, %v2955_v20  ;;  %2225 = vst.msk [vmem:[%s2726_s23 + $0x7] sm:$0xfe] %vm1588_vm7, %v1808_v30  ;;  %v1818_v62 = vadd.f32 %v3184_v59, %v2983_v23  ;;  %v1774_v44 = vmul.f32 0.75, %v1522_v34 }
 0x177   : > { %2227 = vst.msk [vmem:[%s2726_s23 + $0x17] sm:$0xfe] %vm1588_vm7, %v1810_v12  ;;  %v1820_v7 = vadd.f32 %v1798_v6, %v1772_v33  ;;  %v1878_v20 = vrot.slane %v1783_v25, 1  ;;  %v1910_v23 = vadd.f32 %v1876_v28, %v2994_v21  ;;  %v1909_v36 = vadd.f32 %v1877_v19, %v1772_v33 }
 0x178   : > { %2229 = vst.msk [vmem:[%s2726_s23 + $0x27] sm:$0xfe] %vm1588_vm7, %v1812_v43  ;;  %v1822_v29 = vadd.f32 %v1799_v2, %v1774_v44  ;;  %v1912_v31 = vadd.f32 %v1879_v60, %v1775_v63 }
 0x179   : > { %2231 = vst.msk [vmem:[%s2726_s23 + $0x37] sm:$0xfe] %vm1588_vm7, %v1814_v13  ;;  %v1880_v35 = vsel %vm1621_vm6, %v1878_v20, %v1879_v60 }
 0x17a   : > { %1718 = vrot.lane.b32.xlu0 %v1674_v22, %s2319_s24  ;;  %2233 = vst.msk [vmem:[%s2726_s23 + $0x47] sm:$0xfe] %vm1588_vm7, %v1816_v48  ;;  %v1911_v47 = vadd.f32 %v1880_v35, %v1774_v44 }
 0x17b   : > { %2235 = vst.msk [vmem:[%s2726_s23 + $0x57] sm:$0xfe] %vm1588_vm7, %v1818_v62 }
 0x17c   : > { %1722 = vrot.lane.b32.xlu2 %v1676_v49, %s2319_s24  ;;  %2237 = vst.msk [vmem:[%s2726_s23 + $0x67] sm:$0xfe] %vm1588_vm7, %v1820_v7 }
 0x17d   : > { %1720 = vrot.lane.b32.xlu1 %v1675_v8, %s2319_s24  ;;  %2239 = vst.msk [vmem:[%s2726_s23 + $0x77] sm:$0xfe] %vm1588_vm7, %v1822_v29 }
 0x182   : > { %1724 = vrot.lane.b32.xlu0 %v1677_v61, %s2319_s24 }
 0x184   : > { %1955 = vrot.lane.b32.xlu2 %v1910_v23, %s2319_s24 }
 0x185   : > { %1953 = vrot.lane.b32.xlu1 %v1909_v36, %s2319_s24 }
 0x18a   : > { %1957 = vrot.lane.b32.xlu0 %v1911_v47, %s2319_s24 }
 0x18d   : > { %1959 = vrot.lane.b32.xlu1 %v1912_v31, %s2319_s24 }
 0x193   : > { %v1932_v11 = vpop.permute.xlu2 %1931 }
 0x194   : > { %2242 = vst.msk [vmem:[%s2726_s23 + $0xf] sm:$0x1] %vm1744_vm8, %v1932_v11 }
 0x19e   : > { %v1705_v51 = vpop.permute.xlu2 %1704 }
 0x19f   : > { %1749 = vst.msk [vmem:[%s2726_s23 + $0x27] sm:$0x1] %vm1744_vm8, %v1705_v51 }
 0x1a6   : > { %v1703_v55 = vpop.permute.xlu2 %1702 }
 0x1a7   : > { %1748 = vst.msk [vmem:[%s2726_s23 + $0x1f] sm:$0xfe] %vm1742_vm9, %v1703_v55 }
 0x1ac   : > { %v1697_v26 = vpop.permute.xlu0 %1696 }
 0x1ad   : > { %1745 = vst.msk [vmem:[%s2726_s23 + $0x7] sm:$0x1] %vm1744_vm8, %v1697_v26 }
 0x1ae   : > { %v1938_v21 = vpop.permute.xlu2 %1937 }
 0x1af   : > { %v1701_v6 = vpop.permute.xlu1 %1700  ;;  %2245 = vst.msk [vmem:[%s2726_s23 + $0x27] sm:$0xfe] %vm1742_vm9, %v1938_v21 }
 0x1b0   : > { %1747 = vst.msk [vmem:[%s2726_s23 + $0x17] sm:$0x1] %vm1744_vm8, %v1701_v6 }
 0x1b4   : > { %v1695_v5 = vpop.permute.xlu0 %1694 }
 0x1b5   : > { %1743 = vst.msk [vmem:[%s2726_s23 - $0x1] sm:$0xfe] %vm1742_vm9, %v1695_v5 }
 0x1b6   : > { %v1944_v42 = vpop.permute.xlu2 %1943 }
 0x1b7   : > { %v1699_v1 = vpop.permute.xlu1 %1698  ;;  %2248 = vst.msk [vmem:[%s2726_s23 + $0x3f] sm:$0x1] %vm1744_vm8, %v1944_v42 }
 0x1b8   : > { %1746 = vst.msk [vmem:[%s2726_s23 + $0xf] sm:$0xfe] %vm1742_vm9, %v1699_v1 }
 0x1bc   : > { %v1934_v54 = vpop.permute.xlu0 %1933 }
 0x1bd   : > { %2243 = vst.msk [vmem:[%s2726_s23 + $0x17] sm:$0xfe] %vm1742_vm9, %v1934_v54 }
 0x1be   : > { %v1711_v9 = vpop.permute.xlu2 %1710 }
 0x1bf   : > { %v1930_v37 = vpop.permute.xlu1 %1929  ;;  %1752 = vst.msk [vmem:[%s2726_s23 + $0x3f] sm:$0xfe] %vm1742_vm9, %v1711_v9 }
 0x1c0   : > { %2241 = vst.msk [vmem:[%s2726_s23 + $0x7] sm:$0xfe] %vm1742_vm9, %v1930_v37 }
 0x1c4   : > { %v1940_v16 = vpop.permute.xlu0 %1939 }
 0x1c5   : > { %2246 = vst.msk [vmem:[%s2726_s23 + $0x2f] sm:$0x1] %vm1744_vm8, %v1940_v16 }
 0x1c6   : > { %v1717_v14 = vpop.permute.xlu2 %1716 }
 0x1c7   : > { %v1936_v53 = vpop.permute.xlu1 %1935  ;;  %1755 = vst.msk [vmem:[%s2726_s23 + $0x57] sm:$0x1] %vm1744_vm8, %v1717_v14 }
 0x1c8   : > { %2244 = vst.msk [vmem:[%s2726_s23 + $0x1f] sm:$0x1] %vm1744_vm8, %v1936_v53 }
 0x1cc   : > { %v1707_v4 = vpop.permute.xlu0 %1706 }
 0x1cd   : > { %1750 = vst.msk [vmem:[%s2726_s23 + $0x2f] sm:$0xfe] %vm1742_vm9, %v1707_v4 }
 0x1ce   : > { %v1950_v41 = vpop.permute.xlu2 %1949 }
 0x1cf   : > { %v1709_v17 = vpop.permute.xlu1 %1708  ;;  %2251 = vst.msk [vmem:[%s2726_s23 + $0x57] sm:$0xfe] %vm1742_vm9, %v1950_v41 }
 0x1d0   : > { %1751 = vst.msk [vmem:[%s2726_s23 + $0x37] sm:$0x1] %vm1744_vm8, %v1709_v17 }
 0x1d4   : > { %v1713_v46 = vpop.permute.xlu0 %1712 }
 0x1d5   : > { %1753 = vst.msk [vmem:[%s2726_s23 + $0x47] sm:$0x1] %vm1744_vm8, %v1713_v46 }
 0x1d6   : > { %v1723_v24 = vpop.permute.xlu2 %1722 }
 0x1d7   : > { %v1942_v34 = vpop.permute.xlu1 %1941  ;;  %1758 = vst.msk [vmem:[%s2726_s23 + $0x6f] sm:$0xfe] %vm1742_vm9, %v1723_v24 }
 0x1d8   : > { %2247 = vst.msk [vmem:[%s2726_s23 + $0x37] sm:$0xfe] %vm1742_vm9, %v1942_v34 }
 0x1dc   : > { %v1946_v0 = vpop.permute.xlu0 %1945 }
 0x1dd   : > { %2249 = vst.msk [vmem:[%s2726_s23 + $0x47] sm:$0xfe] %vm1742_vm9, %v1946_v0 }
 0x1de   : > { %v1956_v10 = vpop.permute.xlu2 %1955 }
 0x1df   : > { %v1948_v52 = vpop.permute.xlu1 %1947  ;;  %2254 = vst.msk [vmem:[%s2726_s23 + $0x6f] sm:$0x1] %vm1744_vm8, %v1956_v10 }
 0x1e0   : > { %2250 = vst.msk [vmem:[%s2726_s23 + $0x4f] sm:$0x1] %vm1744_vm8, %v1948_v52 }
 0x1e4   : > { %v1952_v3 = vpop.permute.xlu0 %1951 }
 0x1e5   : > { %2252 = vst.msk [vmem:[%s2726_s23 + $0x5f] sm:$0x1] %vm1744_vm8, %v1952_v3 }
 0x1e7   : > { %v1715_v38 = vpop.permute.xlu1 %1714 }
 0x1e8   : > { %1754 = vst.msk [vmem:[%s2726_s23 + $0x4f] sm:$0xfe] %vm1742_vm9, %v1715_v38 }
 0x1ec   : > { %v1719_v25 = vpop.permute.xlu0 %1718 }
 0x1ed   : > { %1756 = vst.msk [vmem:[%s2726_s23 + $0x5f] sm:$0xfe] %vm1742_vm9, %v1719_v25 }
 0x1ef   : > { %v1721_v32 = vpop.permute.xlu1 %1720 }
 0x1f0   : > { %1757 = vst.msk [vmem:[%s2726_s23 + $0x67] sm:$0x1] %vm1744_vm8, %v1721_v32 }
 0x1f4   : > { %v1725_v27 = vpop.permute.xlu0 %1724 }
 0x1f5   : > { %1759 = vst.msk [vmem:[%s2726_s23 + $0x77] sm:$0x1] %vm1744_vm8, %v1725_v27 }
 0x1f7   : > { %v1954_v15 = vpop.permute.xlu1 %1953 }
 0x1f8   : > { %2253 = vst.msk [vmem:[%s2726_s23 + $0x67] sm:$0xfe] %vm1742_vm9, %v1954_v15 }
 0x1fc   : > { %v1958_v22 = vpop.permute.xlu0 %1957 }
 0x1fd   : > { %2255 = vst.msk [vmem:[%s2726_s23 + $0x77] sm:$0xfe] %vm1742_vm9, %v1958_v22 }
 0x1ff   : > { %v1960_v57 = vpop.permute.xlu1 %1959 }
 0x200   : > { %2256 = vst.msk [vmem:[%s2726_s23 + $0x7f] sm:$0x1] %vm1744_vm8, %v1960_v57 }
 0x201 PF: > { %s15_s20 = sadd.s32 1, %s2316_s20   ;;  %s3185_s18 = smov %s2312_s19 }
 0x202   : > { %p12_p5 = scmp.ge.s32.totalorder %s15_s20, 10   ;;  %s3186_s19 = smov %s3188_s1 }
 0x204   :  { %14 = sbr.rel (!%p12_p5) target bundleno = 2 (0x2), region = 89 }

</bundles_post_ra>
